<compile_context>
chip_gen: v7x
topology: tpu7x:2x2x1
jax: 0.10.0
libtpu: 0.0.40
codegen_flags: <defaults>
</compile_context>

<pallas_src>
import jax
import jax.numpy as jnp
import numpy as np
from jax.experimental import pallas as pl
from jax.experimental.pallas import tpu as pltpu


# ---------------------------------------------------------------------------
# Host-side (one-time) weight-folding helpers
# ---------------------------------------------------------------------------
def _conv_row_mats(w, w_in, pad):
    """Per-kernel-row matmul matrices for a stride-1 conv on channel-interleaved
    lanes (lane = x*C + c):  out_rows[y] = sum_i in_rows[y + i] @ mats[i]
    (in_rows already row-padded by `pad`)."""
    c_out, c_in, kh, kw = w.shape
    w_out = w_in + 2 * pad - kw + 1
    m = np.zeros((kh, w_in * c_in, w_out * c_out), np.float32)
    for i in range(kh):
        for x in range(w_out):
            for j in range(kw):
                s = x + j - pad
                if 0 <= s < w_in:
                    m[i, s * c_in:(s + 1) * c_in, x * c_out:(x + 1) * c_out] = \
                        w[:, :, i, j].T  # [ci, co] = w[co, ci, i, j]
    return m


def _sel_rows_blocked(n_blocks, out_per_block, in_per_block, parity):
    """Block-diagonal 0/1 row selector: out row b*out+r <- in row b*in+2r+parity."""
    s = np.zeros((n_blocks * out_per_block, n_blocks * in_per_block), np.float32)
    for b in range(n_blocks):
        for r in range(out_per_block):
            s[b * out_per_block + r, b * in_per_block + 2 * r + parity] = 1.0
    return s


def _sel_cols(x_in, x_out, c, parity):
    """(x_in*c, x_out*c) 0/1 matrix: right-multiply keeps channel c of column
    block 2*x + parity (2x1 pooling step along the interleaved lane axis)."""
    s = np.zeros((x_in * c, x_out * c), np.float32)
    for x in range(x_out):
        for cc in range(c):
            s[(2 * x + parity) * c + cc, x * c + cc] = 1.0
    return s


def _pad2(a, rows, cols):
    out = np.zeros((rows, cols), np.float32)
    out[:a.shape[0], :a.shape[1]] = a
    return out


# ---------------------------------------------------------------------------
# The fused Pallas kernel
# ---------------------------------------------------------------------------
def _net_kernel(xb_ref, m1_ref, b1_ref, sh1_ref, sw1_ref,
                m2_ref, b2_ref, sh2_ref, sw2_ref,
                w1_ref, fb1_ref, g1_ref, be1_ref,
                w2a_ref, fb2a_ref, g2_ref, be2_ref,
                w2b_ref, fb2b_ref, out_ref):
    f32 = jnp.float32
    bf16 = jnp.bfloat16
    nb = out_ref.shape[0]

    def bdot(a, b):               # bf16 x bf16 MXU matmul, f32 accumulation
        return jnp.dot(a.astype(bf16), b, preferred_element_type=f32)

    def fdot(a, b):               # exact f32 matmul (0/1 pooling selections)
        return jnp.dot(a, b, preferred_element_type=f32)

    # ---- conv1 (+bias): one wide-K matmul on the band-stacked padded input ----
    o1 = bdot(xb_ref[...], m1_ref[...]) + b1_ref[...]               # (nb*30, 256)

    # ---- ReLU + MaxPool(2,2) fused as even/odd selection matmuls
    #      (pooling commutes with ReLU, so pool first, ReLU once) ----
    t1 = jnp.maximum(fdot(sh1_ref[0], o1), fdot(sh1_ref[1], o1))    # (nb*15, 256)
    p1 = jnp.maximum(fdot(t1, sw1_ref[0]), fdot(t1, sw1_ref[1]))    # (nb*15, 128)
    p1 = jnp.maximum(p1, 0.0)

    # ---- conv2: gather the 5 kernel-row bands along 128-aligned lane blocks,
    #      then one wide-K matmul (+bias) ----
    x2 = jnp.concatenate(
        [jnp.concatenate([p1[n * 15 + i:n * 15 + i + 11, :] for i in range(5)],
                         axis=1)
         for n in range(nb)], axis=0)                                # (nb*11, 640)
    o2 = bdot(x2, m2_ref[...]) + b2_ref[...]                         # (nb*11, 256)

    t2 = jnp.maximum(fdot(sh2_ref[0], o2), fdot(sh2_ref[1], o2))     # (nb*5, 256)
    p2 = jnp.maximum(fdot(t2, sw2_ref[0]), fdot(t2, sw2_ref[1]))     # (nb*5, 128)
    p2 = jnp.maximum(p2, 0.0)

    # ---- fc1: NCHW flatten folded into the weight; fold each sample's 5 rows
    #      into 128-aligned lane blocks -> one matmul ----
    z = jnp.concatenate(
        [jnp.concatenate([p2[n * 5 + h:n * 5 + h + 1, :] for h in range(5)],
                         axis=1)
         for n in range(nb)], axis=0)                                # (nb, 640)
    h1 = bdot(z, w1_ref[...]) + fb1_ref[...]                         # (nb, 128)

    def bn_relu(h, g, b):
        # Training-mode BatchNorm1d: batch mean, biased variance, eps=1e-5 (f32).
        mean = jnp.mean(h, axis=0, keepdims=True)
        var = jnp.mean((h - mean) * (h - mean), axis=0, keepdims=True)
        return jnp.maximum((h - mean) * jax.lax.rsqrt(var + 1e-5) * g + b, 0.0)

    a1 = bn_relu(h1, g1_ref[...], be1_ref[...])                      # (nb, 128)
    h2 = bdot(a1, w2a_ref[...]) + fb2a_ref[...]                      # (nb, 128)
    a2 = bn_relu(h2, g2_ref[...], be2_ref[...])                      # (nb, 128)
    res = bdot(a2, w2b_ref[...]) + fb2b_ref[...]                     # (nb, 128)
    out_ref[...] = res[:, :out_ref.shape[1]]                         # (nb, 12)


# ---------------------------------------------------------------------------
# pallas_call wrapper (input layout plumbing only)
# ---------------------------------------------------------------------------
def fused_net_forward(kp, x_nchw):
    nb = x_nchw.shape[0]
    x = x_nchw.reshape(nb, 28, 28).astype(jnp.float32)               # C=1
    xp = jnp.pad(x, ((0, 0), (2, 2), (0, 0)))                        # (nb, 32, 28)
    # Band-stack the 3 conv1 kernel rows along lanes: row y of sample n holds
    # [x_pad[y], x_pad[y+1], x_pad[y+2]] (84 lanes), zero-padded to 128 lanes.
    xb = jnp.concatenate([xp[:, i:i + 30, :] for i in range(3)], axis=-1)
    xb = jnp.pad(xb, ((0, 0), (0, 0), (0, 128 - 84)))
    xb = xb.reshape(nb * 30, 128).astype(jnp.bfloat16)

    args = (xb, kp["m1"], kp["b1"], kp["sh1"], kp["sw1"],
            kp["m2"], kp["b2"], kp["sh2"], kp["sw2"],
            kp["w1"], kp["fb1"], kp["g1"], kp["be1"],
            kp["w2a"], kp["fb2a"], kp["g2"], kp["be2"],
            kp["w2b"], kp["fb2b"])
    vspec = pl.BlockSpec(memory_space=pltpu.MemorySpace.VMEM)
    return pl.pallas_call(
        _net_kernel,
        out_shape=jax.ShapeDtypeStruct((nb, 12), jnp.float32),
        in_specs=[vspec] * len(args),
        out_specs=vspec,
    )(*args)


net_forward = jax.jit(fused_net_forward)


# ---------------------------------------------------------------------------
# Parameters (deterministic synthetic init, PyTorch layouts) + folding
# ---------------------------------------------------------------------------
def init_params():
    ks = jax.random.split(jax.random.PRNGKey(42), 10)
    nrm = jax.random.normal
    p = {}
    p["conv1_w"] = 0.1 * nrm(ks[0], (6, 1, 3, 3), jnp.float32)
    p["conv1_b"] = 0.1 * nrm(ks[1], (6,), jnp.float32)
    p["conv2_w"] = 0.1 * nrm(ks[2], (16, 6, 5, 5), jnp.float32)
    p["conv2_b"] = 0.1 * nrm(ks[3], (16,), jnp.float32)
    p["fc1_w"] = 0.05 * nrm(ks[4], (120, 16 * 5 * 5), jnp.float32)   # (out, in)
    p["fc1_b"] = 0.05 * nrm(ks[5], (120,), jnp.float32)
    p["bn1_g"] = jnp.ones((120,), jnp.float32)
    p["bn1_b"] = jnp.zeros((120,), jnp.float32)
    p["fc2a_w"] = 0.05 * nrm(ks[6], (84, 120), jnp.float32)
    p["fc2a_b"] = 0.05 * nrm(ks[7], (84,), jnp.float32)
    p["bn2_g"] = jnp.ones((84,), jnp.float32)
    p["bn2_b"] = jnp.zeros((84,), jnp.float32)
    p["fc2b_w"] = 0.05 * nrm(ks[8], (12, 84), jnp.float32)
    p["fc2b_b"] = 0.05 * nrm(ks[9], (12,), jnp.float32)
    return p


def prepare_kernel_params(p, n_batch):
    """One-time host-side folding: banded conv matrices fused along K, pooling
    selection matrices, flatten-permuted fc1 weight -- all zero-padded to
    128-lane multiples; conv/fc weights stored bf16, selections/biases f32."""
    f32, bf16 = np.float32, jnp.bfloat16
    kp = {}

    # conv1: Conv2d(1, 6, 3, stride=1, pad=2); out lanes x*6+co (180 -> 256).
    m1 = _conv_row_mats(np.asarray(p["conv1_w"], f32), 28, 2)        # (3, 28, 180)
    m1cat = np.zeros((128, 256), f32)
    for i in range(3):
        m1cat[i * 28:(i + 1) * 28, :180] = m1[i]
    kp["m1"] = jnp.asarray(m1cat, bf16)
    kp["b1"] = jnp.asarray(_pad2(np.tile(np.asarray(p["conv1_b"], f32), 30)[None, :],
                                 1, 256))
    kp["sh1"] = jnp.asarray(np.stack([_sel_rows_blocked(n_batch, 15, 30, 0),
                                      _sel_rows_blocked(n_batch, 15, 30, 1)]))
    kp["sw1"] = jnp.asarray(np.stack([_pad2(_sel_cols(30, 15, 6, 0), 256, 128),
                                      _pad2(_sel_cols(30, 15, 6, 1), 256, 128)]))

    # conv2: Conv2d(6, 16, 5); bands live in 128-aligned K blocks (90 valid each).
    m2 = _conv_row_mats(np.asarray(p["conv2_w"], f32), 15, 0)        # (5, 90, 176)
    m2cat = np.zeros((640, 256), f32)
    for i in range(5):
        m2cat[i * 128:i * 128 + 90, :176] = m2[i]
    kp["m2"] = jnp.asarray(m2cat, bf16)
    kp["b2"] = jnp.asarray(_pad2(np.tile(np.asarray(p["conv2_b"], f32), 11)[None, :],
                                 1, 256))
    kp["sh2"] = jnp.asarray(np.stack([_sel_rows_blocked(n_batch, 5, 11, 0),
                                      _sel_rows_blocked(n_batch, 5, 11, 1)]))
    kp["sw2"] = jnp.asarray(np.stack([_pad2(_sel_cols(11, 5, 16, 0), 256, 128),
                                      _pad2(_sel_cols(11, 5, 16, 1), 256, 128)]))

    # fc1: fold the NCHW flatten (feature = c*25 + h*5 + w); rows are
    # h*128 + w*16 + c (matching the pooled activation's lane layout).
    fc1w = np.asarray(p["fc1_w"], f32)                               # (120, 400)
    w1 = np.zeros((640, 128), f32)
    for h in range(5):
        for ww in range(5):
            for c in range(16):
                w1[h * 128 + ww * 16 + c, :120] = fc1w[:, c * 25 + h * 5 + ww]
    kp["w1"] = jnp.asarray(w1, bf16)
    kp["fb1"] = jnp.asarray(_pad2(np.asarray(p["fc1_b"], f32)[None, :], 1, 128))
    kp["g1"] = jnp.asarray(_pad2(np.asarray(p["bn1_g"], f32)[None, :], 1, 128))
    kp["be1"] = jnp.asarray(_pad2(np.asarray(p["bn1_b"], f32)[None, :], 1, 128))

    kp["w2a"] = jnp.asarray(_pad2(np.asarray(p["fc2a_w"], f32).T, 128, 128), bf16)
    kp["fb2a"] = jnp.asarray(_pad2(np.asarray(p["fc2a_b"], f32)[None, :], 1, 128))
    kp["g2"] = jnp.asarray(_pad2(np.asarray(p["bn2_g"], f32)[None, :], 1, 128))
    kp["be2"] = jnp.asarray(_pad2(np.asarray(p["bn2_b"], f32)[None, :], 1, 128))
    kp["w2b"] = jnp.asarray(_pad2(np.asarray(p["fc2b_w"], f32).T, 128, 128), bf16)
    kp["fb2b"] = jnp.asarray(_pad2(np.asarray(p["fc2b_b"], f32)[None, :], 1, 128))
    return kp


# ---------------------------------------------------------------------------
# Pure-JAX reference (built-in correctness check)
# ---------------------------------------------------------------------------
def net_reference(p, x_nchw):
    hp = jax.lax.Precision.HIGHEST

    def bn(z, g, b):
        m = jnp.mean(z, axis=0, keepdims=True)
        v = jnp.mean((z - m) ** 2, axis=0, keepdims=True)
        return (z - m) * jax.lax.rsqrt(v + 1e-5) * g + b

    def pool(z):
        return jax.lax.reduce_window(z, -jnp.inf, jax.lax.max,
                                     (1, 1, 2, 2), (1, 1, 2, 2), "VALID")

    y = jax.lax.conv_general_dilated(x_nchw, p["conv1_w"], (1, 1), ((2, 2), (2, 2)),
                                     dimension_numbers=("NCHW", "OIHW", "NCHW"),
                                     precision=hp)
    y = pool(jnp.maximum(y + p["conv1_b"][None, :, None, None], 0.0))
    y = jax.lax.conv_general_dilated(y, p["conv2_w"], (1, 1), "VALID",
                                     dimension_numbers=("NCHW", "OIHW", "NCHW"),
                                     precision=hp)
    y = pool(jnp.maximum(y + p["conv2_b"][None, :, None, None], 0.0))
    y = y.reshape(y.shape[0], -1)
    y = jnp.maximum(bn(jnp.dot(y, p["fc1_w"].T, precision=hp) + p["fc1_b"],
                       p["bn1_g"], p["bn1_b"]), 0.0)
    y = jnp.maximum(bn(jnp.dot(y, p["fc2a_w"].T, precision=hp) + p["fc2a_b"],
                       p["bn2_g"], p["bn2_b"]), 0.0)
    return jnp.dot(y, p["fc2b_w"].T, precision=hp) + p["fc2b_b"]


if __name__ == "__main__":
    n_batch = 4
    params = init_params()
    kparams = prepare_kernel_params(params, n_batch)
    # Input implied by fc1 (16*5*5 = 400 features): (N, 1, 28, 28).
    x = jax.random.normal(jax.random.PRNGKey(0), (n_batch, 1, 28, 28), jnp.float32)

    out = jax.block_until_ready(net_forward(kparams, x))
    assert out.shape == (n_batch, 12), out.shape
    assert out.dtype == jnp.float32

    # Correctness check against a full-f32 (HIGHEST precision) reference.
    # Tolerance accounts for bf16 matmul operands feeding two training-mode
    # BatchNorms (which rescale by 1/std of the batch); structural/indexing
    # bugs would produce errors of the order of the activations (>> 0.1).
    ref = net_reference(params, x)
    np.testing.assert_allclose(np.asarray(out), np.asarray(ref),
                               rtol=1e-1, atol=1e-1)

    print("KERNEL_OK")
</pallas_src>

<mosaic_0001>
module attributes {stable_mosaic.version = 11 : i64} {
  func.func @_net_kernel(%arg0: memref<120x128xbf16, #tpu.memory_space<vmem>>, %arg1: memref<128x256xbf16, #tpu.memory_space<vmem>>, %arg2: memref<1x256xf32, #tpu.memory_space<vmem>>, %arg3: memref<2x60x120xf32, #tpu.memory_space<vmem>>, %arg4: memref<2x256x128xf32, #tpu.memory_space<vmem>>, %arg5: memref<640x256xbf16, #tpu.memory_space<vmem>>, %arg6: memref<1x256xf32, #tpu.memory_space<vmem>>, %arg7: memref<2x20x44xf32, #tpu.memory_space<vmem>>, %arg8: memref<2x256x128xf32, #tpu.memory_space<vmem>>, %arg9: memref<640x128xbf16, #tpu.memory_space<vmem>>, %arg10: memref<1x128xf32, #tpu.memory_space<vmem>>, %arg11: memref<1x128xf32, #tpu.memory_space<vmem>>, %arg12: memref<1x128xf32, #tpu.memory_space<vmem>>, %arg13: memref<128x128xbf16, #tpu.memory_space<vmem>>, %arg14: memref<1x128xf32, #tpu.memory_space<vmem>>, %arg15: memref<1x128xf32, #tpu.memory_space<vmem>>, %arg16: memref<1x128xf32, #tpu.memory_space<vmem>>, %arg17: memref<128x128xbf16, #tpu.memory_space<vmem>>, %arg18: memref<1x128xf32, #tpu.memory_space<vmem>>, %arg19: memref<4x12xf32, #tpu.memory_space<vmem>>) attributes {dimension_semantics = [], scalar_prefetch = 0 : i64, scratch_operands = 0 : i64, tpu.core_type = #tpu.core_type<tc>} {
    %c0 = arith.constant 0 : index
    %c0_0 = arith.constant 0 : index
    %0 = vector.load %arg0[%c0, %c0_0] : memref<120x128xbf16, #tpu.memory_space<vmem>>, vector<120x128xbf16>
    %c0_1 = arith.constant 0 : index
    %c0_2 = arith.constant 0 : index
    %1 = vector.load %arg1[%c0_1, %c0_2] : memref<128x256xbf16, #tpu.memory_space<vmem>>, vector<128x256xbf16>
    %cst = arith.constant dense<0.000000e+00> : vector<120x256xf32>
    %2 = tpu.matmul %0, %1, %cst {dimension_numbers = #tpu.dot_dimension_numbers<[1], [0], [0], [1], [0, 0, 1, 1], [], []>} : vector<120x128xbf16>, vector<128x256xbf16>, vector<120x256xf32> -> vector<120x256xf32>
    %c0_3 = arith.constant 0 : index
    %c0_4 = arith.constant 0 : index
    %3 = vector.load %arg2[%c0_3, %c0_4] : memref<1x256xf32, #tpu.memory_space<vmem>>, vector<1x256xf32>
    %4 = vector.broadcast %3 : vector<1x256xf32> to vector<120x256xf32>
    %5 = arith.addf %2, %4 : vector<120x256xf32>
    %c0_5 = arith.constant 0 : index
    %c0_6 = arith.constant 0 : index
    %c0_7 = arith.constant 0 : index
    %6 = vector.load %arg3[%c0_5, %c0_6, %c0_7] : memref<2x60x120xf32, #tpu.memory_space<vmem>>, vector<1x60x120xf32>
    %7 = vector.shape_cast %6 : vector<1x60x120xf32> to vector<60x120xf32>
    %cst_8 = arith.constant dense<0.000000e+00> : vector<60x256xf32>
    %8 = tpu.matmul %7, %5, %cst_8 {dimension_numbers = #tpu.dot_dimension_numbers<[1], [0], [0], [1], [0, 0, 1, 1], [], []>} : vector<60x120xf32>, vector<120x256xf32>, vector<60x256xf32> -> vector<60x256xf32>
    %c1 = arith.constant 1 : index
    %c0_9 = arith.constant 0 : index
    %c0_10 = arith.constant 0 : index
    %9 = vector.load %arg3[%c1, %c0_9, %c0_10] : memref<2x60x120xf32, #tpu.memory_space<vmem>>, vector<1x60x120xf32>
    %10 = vector.shape_cast %9 : vector<1x60x120xf32> to vector<60x120xf32>
    %cst_11 = arith.constant dense<0.000000e+00> : vector<60x256xf32>
    %11 = tpu.matmul %10, %5, %cst_11 {dimension_numbers = #tpu.dot_dimension_numbers<[1], [0], [0], [1], [0, 0, 1, 1], [], []>} : vector<60x120xf32>, vector<120x256xf32>, vector<60x256xf32> -> vector<60x256xf32>
    %12 = arith.maximumf %8, %11 : vector<60x256xf32>
    %c0_12 = arith.constant 0 : index
    %c0_13 = arith.constant 0 : index
    %c0_14 = arith.constant 0 : index
    %13 = vector.load %arg4[%c0_12, %c0_13, %c0_14] : memref<2x256x128xf32, #tpu.memory_space<vmem>>, vector<1x256x128xf32>
    %14 = vector.shape_cast %13 : vector<1x256x128xf32> to vector<256x128xf32>
    %cst_15 = arith.constant dense<0.000000e+00> : vector<60x128xf32>
    %15 = tpu.matmul %12, %14, %cst_15 {dimension_numbers = #tpu.dot_dimension_numbers<[1], [0], [0], [1], [0, 0, 1, 1], [], []>} : vector<60x256xf32>, vector<256x128xf32>, vector<60x128xf32> -> vector<60x128xf32>
    %c1_16 = arith.constant 1 : index
    %c0_17 = arith.constant 0 : index
    %c0_18 = arith.constant 0 : index
    %16 = vector.load %arg4[%c1_16, %c0_17, %c0_18] : memref<2x256x128xf32, #tpu.memory_space<vmem>>, vector<1x256x128xf32>
    %17 = vector.shape_cast %16 : vector<1x256x128xf32> to vector<256x128xf32>
    %cst_19 = arith.constant dense<0.000000e+00> : vector<60x128xf32>
    %18 = tpu.matmul %12, %17, %cst_19 {dimension_numbers = #tpu.dot_dimension_numbers<[1], [0], [0], [1], [0, 0, 1, 1], [], []>} : vector<60x256xf32>, vector<256x128xf32>, vector<60x128xf32> -> vector<60x128xf32>
    %19 = arith.maximumf %15, %18 : vector<60x128xf32>
    %cst_20 = arith.constant 0.000000e+00 : f32
    %20 = vector.broadcast %cst_20 : f32 to vector<60x128xf32>
    %21 = arith.maximumf %19, %20 : vector<60x128xf32>
    %22 = vector.extract_strided_slice %21 {offsets = [0, 0], sizes = [11, 128], strides = [1, 1]} : vector<60x128xf32> to vector<11x128xf32>
    %23 = vector.extract_strided_slice %21 {offsets = [1, 0], sizes = [11, 128], strides = [1, 1]} : vector<60x128xf32> to vector<11x128xf32>
    %24 = vector.extract_strided_slice %21 {offsets = [2, 0], sizes = [11, 128], strides = [1, 1]} : vector<60x128xf32> to vector<11x128xf32>
    %25 = vector.extract_strided_slice %21 {offsets = [3, 0], sizes = [11, 128], strides = [1, 1]} : vector<60x128xf32> to vector<11x128xf32>
    %26 = vector.extract_strided_slice %21 {offsets = [4, 0], sizes = [11, 128], strides = [1, 1]} : vector<60x128xf32> to vector<11x128xf32>
    %27 = tpu.concatenate %22, %23, %24, %25, %26 in 1 : vector<11x128xf32>, vector<11x128xf32>, vector<11x128xf32>, vector<11x128xf32>, vector<11x128xf32> -> vector<11x640xf32>
    %28 = vector.extract_strided_slice %21 {offsets = [15, 0], sizes = [11, 128], strides = [1, 1]} : vector<60x128xf32> to vector<11x128xf32>
    %29 = vector.extract_strided_slice %21 {offsets = [16, 0], sizes = [11, 128], strides = [1, 1]} : vector<60x128xf32> to vector<11x128xf32>
    %30 = vector.extract_strided_slice %21 {offsets = [17, 0], sizes = [11, 128], strides = [1, 1]} : vector<60x128xf32> to vector<11x128xf32>
    %31 = vector.extract_strided_slice %21 {offsets = [18, 0], sizes = [11, 128], strides = [1, 1]} : vector<60x128xf32> to vector<11x128xf32>
    %32 = vector.extract_strided_slice %21 {offsets = [19, 0], sizes = [11, 128], strides = [1, 1]} : vector<60x128xf32> to vector<11x128xf32>
    %33 = tpu.concatenate %28, %29, %30, %31, %32 in 1 : vector<11x128xf32>, vector<11x128xf32>, vector<11x128xf32>, vector<11x128xf32>, vector<11x128xf32> -> vector<11x640xf32>
    %34 = vector.extract_strided_slice %21 {offsets = [30, 0], sizes = [11, 128], strides = [1, 1]} : vector<60x128xf32> to vector<11x128xf32>
    %35 = vector.extract_strided_slice %21 {offsets = [31, 0], sizes = [11, 128], strides = [1, 1]} : vector<60x128xf32> to vector<11x128xf32>
    %36 = vector.extract_strided_slice %21 {offsets = [32, 0], sizes = [11, 128], strides = [1, 1]} : vector<60x128xf32> to vector<11x128xf32>
    %37 = vector.extract_strided_slice %21 {offsets = [33, 0], sizes = [11, 128], strides = [1, 1]} : vector<60x128xf32> to vector<11x128xf32>
    %38 = vector.extract_strided_slice %21 {offsets = [34, 0], sizes = [11, 128], strides = [1, 1]} : vector<60x128xf32> to vector<11x128xf32>
    %39 = tpu.concatenate %34, %35, %36, %37, %38 in 1 : vector<11x128xf32>, vector<11x128xf32>, vector<11x128xf32>, vector<11x128xf32>, vector<11x128xf32> -> vector<11x640xf32>
    %40 = vector.extract_strided_slice %21 {offsets = [45, 0], sizes = [11, 128], strides = [1, 1]} : vector<60x128xf32> to vector<11x128xf32>
    %41 = vector.extract_strided_slice %21 {offsets = [46, 0], sizes = [11, 128], strides = [1, 1]} : vector<60x128xf32> to vector<11x128xf32>
    %42 = vector.extract_strided_slice %21 {offsets = [47, 0], sizes = [11, 128], strides = [1, 1]} : vector<60x128xf32> to vector<11x128xf32>
    %43 = vector.extract_strided_slice %21 {offsets = [48, 0], sizes = [11, 128], strides = [1, 1]} : vector<60x128xf32> to vector<11x128xf32>
    %44 = vector.extract_strided_slice %21 {offsets = [49, 0], sizes = [11, 128], strides = [1, 1]} : vector<60x128xf32> to vector<11x128xf32>
    %45 = tpu.concatenate %40, %41, %42, %43, %44 in 1 : vector<11x128xf32>, vector<11x128xf32>, vector<11x128xf32>, vector<11x128xf32>, vector<11x128xf32> -> vector<11x640xf32>
    %46 = tpu.concatenate %27, %33, %39, %45 in 0 : vector<11x640xf32>, vector<11x640xf32>, vector<11x640xf32>, vector<11x640xf32> -> vector<44x640xf32>
    %c0_21 = arith.constant 0 : index
    %c0_22 = arith.constant 0 : index
    %47 = vector.load %arg5[%c0_21, %c0_22] : memref<640x256xbf16, #tpu.memory_space<vmem>>, vector<640x256xbf16>
    %48 = arith.truncf %46 : vector<44x640xf32> to vector<44x640xbf16>
    %cst_23 = arith.constant dense<0.000000e+00> : vector<44x256xf32>
    %49 = tpu.matmul %48, %47, %cst_23 {dimension_numbers = #tpu.dot_dimension_numbers<[1], [0], [0], [1], [0, 0, 1, 1], [], []>} : vector<44x640xbf16>, vector<640x256xbf16>, vector<44x256xf32> -> vector<44x256xf32>
    %c0_24 = arith.constant 0 : index
    %c0_25 = arith.constant 0 : index
    %50 = vector.load %arg6[%c0_24, %c0_25] : memref<1x256xf32, #tpu.memory_space<vmem>>, vector<1x256xf32>
    %51 = vector.broadcast %50 : vector<1x256xf32> to vector<44x256xf32>
    %52 = arith.addf %49, %51 : vector<44x256xf32>
    %c0_26 = arith.constant 0 : index
    %c0_27 = arith.constant 0 : index
    %c0_28 = arith.constant 0 : index
    %53 = vector.load %arg7[%c0_26, %c0_27, %c0_28] : memref<2x20x44xf32, #tpu.memory_space<vmem>>, vector<1x20x44xf32>
    %54 = vector.shape_cast %53 : vector<1x20x44xf32> to vector<20x44xf32>
    %cst_29 = arith.constant dense<0.000000e+00> : vector<20x256xf32>
    %55 = tpu.matmul %54, %52, %cst_29 {dimension_numbers = #tpu.dot_dimension_numbers<[1], [0], [0], [1], [0, 0, 1, 1], [], []>} : vector<20x44xf32>, vector<44x256xf32>, vector<20x256xf32> -> vector<20x256xf32>
    %c1_30 = arith.constant 1 : index
    %c0_31 = arith.constant 0 : index
    %c0_32 = arith.constant 0 : index
    %56 = vector.load %arg7[%c1_30, %c0_31, %c0_32] : memref<2x20x44xf32, #tpu.memory_space<vmem>>, vector<1x20x44xf32>
    %57 = vector.shape_cast %56 : vector<1x20x44xf32> to vector<20x44xf32>
    %cst_33 = arith.constant dense<0.000000e+00> : vector<20x256xf32>
    %58 = tpu.matmul %57, %52, %cst_33 {dimension_numbers = #tpu.dot_dimension_numbers<[1], [0], [0], [1], [0, 0, 1, 1], [], []>} : vector<20x44xf32>, vector<44x256xf32>, vector<20x256xf32> -> vector<20x256xf32>
    %59 = arith.maximumf %55, %58 : vector<20x256xf32>
    %c0_34 = arith.constant 0 : index
    %c0_35 = arith.constant 0 : index
    %c0_36 = arith.constant 0 : index
    %60 = vector.load %arg8[%c0_34, %c0_35, %c0_36] : memref<2x256x128xf32, #tpu.memory_space<vmem>>, vector<1x256x128xf32>
    %61 = vector.shape_cast %60 : vector<1x256x128xf32> to vector<256x128xf32>
    %cst_37 = arith.constant dense<0.000000e+00> : vector<20x128xf32>
    %62 = tpu.matmul %59, %61, %cst_37 {dimension_numbers = #tpu.dot_dimension_numbers<[1], [0], [0], [1], [0, 0, 1, 1], [], []>} : vector<20x256xf32>, vector<256x128xf32>, vector<20x128xf32> -> vector<20x128xf32>
    %c1_38 = arith.constant 1 : index
    %c0_39 = arith.constant 0 : index
    %c0_40 = arith.constant 0 : index
    %63 = vector.load %arg8[%c1_38, %c0_39, %c0_40] : memref<2x256x128xf32, #tpu.memory_space<vmem>>, vector<1x256x128xf32>
    %64 = vector.shape_cast %63 : vector<1x256x128xf32> to vector<256x128xf32>
    %cst_41 = arith.constant dense<0.000000e+00> : vector<20x128xf32>
    %65 = tpu.matmul %59, %64, %cst_41 {dimension_numbers = #tpu.dot_dimension_numbers<[1], [0], [0], [1], [0, 0, 1, 1], [], []>} : vector<20x256xf32>, vector<256x128xf32>, vector<20x128xf32> -> vector<20x128xf32>
    %66 = arith.maximumf %62, %65 : vector<20x128xf32>
    %cst_42 = arith.constant 0.000000e+00 : f32
    %67 = vector.broadcast %cst_42 : f32 to vector<20x128xf32>
    %68 = arith.maximumf %66, %67 : vector<20x128xf32>
    %69 = vector.extract_strided_slice %68 {offsets = [0, 0], sizes = [1, 128], strides = [1, 1]} : vector<20x128xf32> to vector<1x128xf32>
    %70 = vector.extract_strided_slice %68 {offsets = [1, 0], sizes = [1, 128], strides = [1, 1]} : vector<20x128xf32> to vector<1x128xf32>
    %71 = vector.extract_strided_slice %68 {offsets = [2, 0], sizes = [1, 128], strides = [1, 1]} : vector<20x128xf32> to vector<1x128xf32>
    %72 = vector.extract_strided_slice %68 {offsets = [3, 0], sizes = [1, 128], strides = [1, 1]} : vector<20x128xf32> to vector<1x128xf32>
    %73 = vector.extract_strided_slice %68 {offsets = [4, 0], sizes = [1, 128], strides = [1, 1]} : vector<20x128xf32> to vector<1x128xf32>
    %74 = tpu.concatenate %69, %70, %71, %72, %73 in 1 : vector<1x128xf32>, vector<1x128xf32>, vector<1x128xf32>, vector<1x128xf32>, vector<1x128xf32> -> vector<1x640xf32>
    %75 = vector.extract_strided_slice %68 {offsets = [5, 0], sizes = [1, 128], strides = [1, 1]} : vector<20x128xf32> to vector<1x128xf32>
    %76 = vector.extract_strided_slice %68 {offsets = [6, 0], sizes = [1, 128], strides = [1, 1]} : vector<20x128xf32> to vector<1x128xf32>
    %77 = vector.extract_strided_slice %68 {offsets = [7, 0], sizes = [1, 128], strides = [1, 1]} : vector<20x128xf32> to vector<1x128xf32>
    %78 = vector.extract_strided_slice %68 {offsets = [8, 0], sizes = [1, 128], strides = [1, 1]} : vector<20x128xf32> to vector<1x128xf32>
    %79 = vector.extract_strided_slice %68 {offsets = [9, 0], sizes = [1, 128], strides = [1, 1]} : vector<20x128xf32> to vector<1x128xf32>
    %80 = tpu.concatenate %75, %76, %77, %78, %79 in 1 : vector<1x128xf32>, vector<1x128xf32>, vector<1x128xf32>, vector<1x128xf32>, vector<1x128xf32> -> vector<1x640xf32>
    %81 = vector.extract_strided_slice %68 {offsets = [10, 0], sizes = [1, 128], strides = [1, 1]} : vector<20x128xf32> to vector<1x128xf32>
    %82 = vector.extract_strided_slice %68 {offsets = [11, 0], sizes = [1, 128], strides = [1, 1]} : vector<20x128xf32> to vector<1x128xf32>
    %83 = vector.extract_strided_slice %68 {offsets = [12, 0], sizes = [1, 128], strides = [1, 1]} : vector<20x128xf32> to vector<1x128xf32>
    %84 = vector.extract_strided_slice %68 {offsets = [13, 0], sizes = [1, 128], strides = [1, 1]} : vector<20x128xf32> to vector<1x128xf32>
    %85 = vector.extract_strided_slice %68 {offsets = [14, 0], sizes = [1, 128], strides = [1, 1]} : vector<20x128xf32> to vector<1x128xf32>
    %86 = tpu.concatenate %81, %82, %83, %84, %85 in 1 : vector<1x128xf32>, vector<1x128xf32>, vector<1x128xf32>, vector<1x128xf32>, vector<1x128xf32> -> vector<1x640xf32>
    %87 = vector.extract_strided_slice %68 {offsets = [15, 0], sizes = [1, 128], strides = [1, 1]} : vector<20x128xf32> to vector<1x128xf32>
    %88 = vector.extract_strided_slice %68 {offsets = [16, 0], sizes = [1, 128], strides = [1, 1]} : vector<20x128xf32> to vector<1x128xf32>
    %89 = vector.extract_strided_slice %68 {offsets = [17, 0], sizes = [1, 128], strides = [1, 1]} : vector<20x128xf32> to vector<1x128xf32>
    %90 = vector.extract_strided_slice %68 {offsets = [18, 0], sizes = [1, 128], strides = [1, 1]} : vector<20x128xf32> to vector<1x128xf32>
    %91 = vector.extract_strided_slice %68 {offsets = [19, 0], sizes = [1, 128], strides = [1, 1]} : vector<20x128xf32> to vector<1x128xf32>
    %92 = tpu.concatenate %87, %88, %89, %90, %91 in 1 : vector<1x128xf32>, vector<1x128xf32>, vector<1x128xf32>, vector<1x128xf32>, vector<1x128xf32> -> vector<1x640xf32>
    %93 = tpu.concatenate %74, %80, %86, %92 in 0 : vector<1x640xf32>, vector<1x640xf32>, vector<1x640xf32>, vector<1x640xf32> -> vector<4x640xf32>
    %c0_43 = arith.constant 0 : index
    %c0_44 = arith.constant 0 : index
    %94 = vector.load %arg9[%c0_43, %c0_44] : memref<640x128xbf16, #tpu.memory_space<vmem>>, vector<640x128xbf16>
    %95 = arith.truncf %93 : vector<4x640xf32> to vector<4x640xbf16>
    %cst_45 = arith.constant dense<0.000000e+00> : vector<4x128xf32>
    %96 = tpu.matmul %95, %94, %cst_45 {dimension_numbers = #tpu.dot_dimension_numbers<[1], [0], [0], [1], [0, 0, 1, 1], [], []>} : vector<4x640xbf16>, vector<640x128xbf16>, vector<4x128xf32> -> vector<4x128xf32>
    %c0_46 = arith.constant 0 : index
    %c0_47 = arith.constant 0 : index
    %97 = vector.load %arg10[%c0_46, %c0_47] : memref<1x128xf32, #tpu.memory_space<vmem>>, vector<1x128xf32>
    %98 = vector.broadcast %97 : vector<1x128xf32> to vector<4x128xf32>
    %99 = arith.addf %96, %98 : vector<4x128xf32>
    %c0_48 = arith.constant 0 : index
    %c0_49 = arith.constant 0 : index
    %100 = vector.load %arg11[%c0_48, %c0_49] : memref<1x128xf32, #tpu.memory_space<vmem>>, vector<1x128xf32>
    %c0_50 = arith.constant 0 : index
    %c0_51 = arith.constant 0 : index
    %101 = vector.load %arg12[%c0_50, %c0_51] : memref<1x128xf32, #tpu.memory_space<vmem>>, vector<1x128xf32>
    %cst_52 = arith.constant dense<0.000000e+00> : vector<128xf32>
    %102 = vector.multi_reduction <add>, %99, %cst_52 [0] : vector<4x128xf32> to vector<128xf32>
    %103 = vector.shape_cast %102 : vector<128xf32> to vector<1x128xf32>
    %cst_53 = arith.constant 4.000000e+00 : f32
    %104 = vector.broadcast %cst_53 : f32 to vector<1x128xf32>
    %105 = arith.divf %103, %104 : vector<1x128xf32>
    %106 = vector.broadcast %105 : vector<1x128xf32> to vector<4x128xf32>
    %107 = arith.subf %99, %106 : vector<4x128xf32>
    %108 = vector.broadcast %105 : vector<1x128xf32> to vector<4x128xf32>
    %109 = arith.subf %99, %108 : vector<4x128xf32>
    %110 = arith.mulf %107, %109 : vector<4x128xf32>
    %cst_54 = arith.constant dense<0.000000e+00> : vector<128xf32>
    %111 = vector.multi_reduction <add>, %110, %cst_54 [0] : vector<4x128xf32> to vector<128xf32>
    %112 = vector.shape_cast %111 : vector<128xf32> to vector<1x128xf32>
    %cst_55 = arith.constant 4.000000e+00 : f32
    %113 = vector.broadcast %cst_55 : f32 to vector<1x128xf32>
    %114 = arith.divf %112, %113 : vector<1x128xf32>
    %115 = vector.broadcast %105 : vector<1x128xf32> to vector<4x128xf32>
    %116 = arith.subf %99, %115 : vector<4x128xf32>
    %cst_56 = arith.constant 9.99999974E-6 : f32
    %117 = vector.broadcast %cst_56 : f32 to vector<1x128xf32>
    %118 = arith.addf %114, %117 : vector<1x128xf32>
    %119 = math.rsqrt %118 : vector<1x128xf32>
    %120 = vector.broadcast %119 : vector<1x128xf32> to vector<4x128xf32>
    %121 = arith.mulf %116, %120 : vector<4x128xf32>
    %122 = vector.broadcast %100 : vector<1x128xf32> to vector<4x128xf32>
    %123 = arith.mulf %121, %122 : vector<4x128xf32>
    %124 = vector.broadcast %101 : vector<1x128xf32> to vector<4x128xf32>
    %125 = arith.addf %123, %124 : vector<4x128xf32>
    %cst_57 = arith.constant 0.000000e+00 : f32
    %126 = vector.broadcast %cst_57 : f32 to vector<4x128xf32>
    %127 = arith.maximumf %125, %126 : vector<4x128xf32>
    %c0_58 = arith.constant 0 : index
    %c0_59 = arith.constant 0 : index
    %128 = vector.load %arg13[%c0_58, %c0_59] : memref<128x128xbf16, #tpu.memory_space<vmem>>, vector<128x128xbf16>
    %129 = arith.truncf %127 : vector<4x128xf32> to vector<4x128xbf16>
    %cst_60 = arith.constant dense<0.000000e+00> : vector<4x128xf32>
    %130 = tpu.matmul %129, %128, %cst_60 {dimension_numbers = #tpu.dot_dimension_numbers<[1], [0], [0], [1], [0, 0, 1, 1], [], []>} : vector<4x128xbf16>, vector<128x128xbf16>, vector<4x128xf32> -> vector<4x128xf32>
    %c0_61 = arith.constant 0 : index
    %c0_62 = arith.constant 0 : index
    %131 = vector.load %arg14[%c0_61, %c0_62] : memref<1x128xf32, #tpu.memory_space<vmem>>, vector<1x128xf32>
    %132 = vector.broadcast %131 : vector<1x128xf32> to vector<4x128xf32>
    %133 = arith.addf %130, %132 : vector<4x128xf32>
    %c0_63 = arith.constant 0 : index
    %c0_64 = arith.constant 0 : index
    %134 = vector.load %arg15[%c0_63, %c0_64] : memref<1x128xf32, #tpu.memory_space<vmem>>, vector<1x128xf32>
    %c0_65 = arith.constant 0 : index
    %c0_66 = arith.constant 0 : index
    %135 = vector.load %arg16[%c0_65, %c0_66] : memref<1x128xf32, #tpu.memory_space<vmem>>, vector<1x128xf32>
    %cst_67 = arith.constant dense<0.000000e+00> : vector<128xf32>
    %136 = vector.multi_reduction <add>, %133, %cst_67 [0] : vector<4x128xf32> to vector<128xf32>
    %137 = vector.shape_cast %136 : vector<128xf32> to vector<1x128xf32>
    %cst_68 = arith.constant 4.000000e+00 : f32
    %138 = vector.broadcast %cst_68 : f32 to vector<1x128xf32>
    %139 = arith.divf %137, %138 : vector<1x128xf32>
    %140 = vector.broadcast %139 : vector<1x128xf32> to vector<4x128xf32>
    %141 = arith.subf %133, %140 : vector<4x128xf32>
    %142 = vector.broadcast %139 : vector<1x128xf32> to vector<4x128xf32>
    %143 = arith.subf %133, %142 : vector<4x128xf32>
    %144 = arith.mulf %141, %143 : vector<4x128xf32>
    %cst_69 = arith.constant dense<0.000000e+00> : vector<128xf32>
    %145 = vector.multi_reduction <add>, %144, %cst_69 [0] : vector<4x128xf32> to vector<128xf32>
    %146 = vector.shape_cast %145 : vector<128xf32> to vector<1x128xf32>
    %cst_70 = arith.constant 4.000000e+00 : f32
    %147 = vector.broadcast %cst_70 : f32 to vector<1x128xf32>
    %148 = arith.divf %146, %147 : vector<1x128xf32>
    %149 = vector.broadcast %139 : vector<1x128xf32> to vector<4x128xf32>
    %150 = arith.subf %133, %149 : vector<4x128xf32>
    %cst_71 = arith.constant 9.99999974E-6 : f32
    %151 = vector.broadcast %cst_71 : f32 to vector<1x128xf32>
    %152 = arith.addf %148, %151 : vector<1x128xf32>
    %153 = math.rsqrt %152 : vector<1x128xf32>
    %154 = vector.broadcast %153 : vector<1x128xf32> to vector<4x128xf32>
    %155 = arith.mulf %150, %154 : vector<4x128xf32>
    %156 = vector.broadcast %134 : vector<1x128xf32> to vector<4x128xf32>
    %157 = arith.mulf %155, %156 : vector<4x128xf32>
    %158 = vector.broadcast %135 : vector<1x128xf32> to vector<4x128xf32>
    %159 = arith.addf %157, %158 : vector<4x128xf32>
    %cst_72 = arith.constant 0.000000e+00 : f32
    %160 = vector.broadcast %cst_72 : f32 to vector<4x128xf32>
    %161 = arith.maximumf %159, %160 : vector<4x128xf32>
    %c0_73 = arith.constant 0 : index
    %c0_74 = arith.constant 0 : index
    %162 = vector.load %arg17[%c0_73, %c0_74] : memref<128x128xbf16, #tpu.memory_space<vmem>>, vector<128x128xbf16>
    %163 = arith.truncf %161 : vector<4x128xf32> to vector<4x128xbf16>
    %cst_75 = arith.constant dense<0.000000e+00> : vector<4x128xf32>
    %164 = tpu.matmul %163, %162, %cst_75 {dimension_numbers = #tpu.dot_dimension_numbers<[1], [0], [0], [1], [0, 0, 1, 1], [], []>} : vector<4x128xbf16>, vector<128x128xbf16>, vector<4x128xf32> -> vector<4x128xf32>
    %c0_76 = arith.constant 0 : index
    %c0_77 = arith.constant 0 : index
    %165 = vector.load %arg18[%c0_76, %c0_77] : memref<1x128xf32, #tpu.memory_space<vmem>>, vector<1x128xf32>
    %166 = vector.broadcast %165 : vector<1x128xf32> to vector<4x128xf32>
    %167 = arith.addf %164, %166 : vector<4x128xf32>
    %168 = vector.extract_strided_slice %167 {offsets = [0, 0], sizes = [4, 12], strides = [1, 1]} : vector<4x128xf32> to vector<4x12xf32>
    %c0_78 = arith.constant 0 : index
    %c0_79 = arith.constant 0 : index
    %169 = vector.load %arg19[%c0_78, %c0_79] : memref<4x12xf32, #tpu.memory_space<vmem>>, vector<4x12xf32>
    tpu.vector_store %arg19[%c0_78, %c0_79], %168 {strides = array<i32>} : memref<4x12xf32, #tpu.memory_space<vmem>>, vector<4x12xf32>,
    return
  }
}

</mosaic_0001>

<bundles_post_ra>
// kernel: fused_net_forward.1
= control target key start
LH: loop header
LB: loop body
LE: loop exit
PB: predicated region body
PF: predicated region fallthrough
CT: control target
= control target key end

     0   :  { %s5599_s0 = inlined_call_operand.vmem [shape: bf16[120,128], index: 0, kind: input, shape index: {}]   ;;  %s5600_s1 = inlined_call_operand.vmem [shape: bf16[128,256], index: 1, kind: input, shape index: {}]   ;;  %s5601_s2 = inlined_call_operand.vmem [shape: f32[1,256], index: 2, kind: input, shape index: {}]   ;;  %s5602_s3 = inlined_call_operand.vmem [shape: f32[2,60,120], index: 3, kind: input, shape index: {}]   ;;  %s5603_s4 = inlined_call_operand.vmem [shape: f32[2,256,128], index: 4, kind: input, shape index: {}]   ;;  %s5604_s5 = inlined_call_operand.vmem [shape: bf16[640,256], index: 5, kind: input, shape index: {}]   ;;  %s5605_s6 = inlined_call_operand.vmem [shape: f32[1,256], index: 6, kind: input, shape index: {}]   ;;  %s5606_s7 = inlined_call_operand.vmem [shape: f32[2,20,44], index: 7, kind: input, shape index: {}]   ;;  %s5607_s8 = inlined_call_operand.hbm [shape: f32[2,256,128], index: 8, kind: input, shape index: {}]   ;;  %s5608_s9 = inlined_call_operand.vmem [shape: bf16[640,128], index: 9, kind: input, shape index: {}]   ;;  %s5609_s10 = inlined_call_operand.vmem [shape: f32[1,128], index: 10, kind: input, shape index: {}]   ;;  %s5610_s11 = inlined_call_operand.vmem [shape: f32[1,128], index: 11, kind: input, shape index: {}]   ;;  %s5611_s12 = inlined_call_operand.vmem [shape: f32[1,128], index: 12, kind: input, shape index: {}]   ;;  %s5612_s13 = inlined_call_operand.hbm [shape: bf16[128,128], index: 13, kind: input, shape index: {}]   ;;  %s5613_s14 = inlined_call_operand.vmem [shape: f32[1,128], index: 14, kind: input, shape index: {}]   ;;  %s5614_s15 = inlined_call_operand.vmem [shape: f32[1,128], index: 15, kind: input, shape index: {}]   ;;  %s5615_s16 = inlined_call_operand.vmem [shape: f32[1,128], index: 16, kind: input, shape index: {}]   ;;  %s5616_s17 = inlined_call_operand.hbm [shape: bf16[128,128], index: 17, kind: input, shape index: {}]   ;;  %s5617_s18 = inlined_call_operand.hbm [shape: f32[1,128], index: 18, kind: input, shape index: {}]   ;;  %s5618_s19 = inlined_call_operand.hbm [shape: f32[4,12], index: 19, kind: output, shape index: {}]  }
   0x1   :  { %5624 = sst [smem:[#allocation15_spill]] %s5599_s0 }
   0x2   :  { %5625 = sst [smem:[#allocation16_spill]] %s5600_s1 }
   0x3   :  { %5626 = sst [smem:[#allocation17_spill]] %s5601_s2 }
   0x4   :  { %5627 = sst [smem:[#allocation18_spill]] %s5602_s3 }
   0x5   :  { %24 = vsyncpa [#allocation3], 0 }
   0x6   :  { %25 = vsyncpa [#allocation6], 0 }
   0x7   :  { %26 = vsyncpa [#allocation9], 0 }
   0x8   :  { %27 = vsyncpa [#allocation4], 0  ;;  %s4264_s0 = smov [#allocation5]   ;;  %s4146_s1 = scalar_lea.hbm %s5612_s13, 1024 }
   0x9   :  { %s69_s30 = sshll.u32 %s4264_s0, 4  ;;  %p4147_p0 = scmp.ne.s32.totalorder %s5612_s13, %s4146_s1  ;;  %s70_s30 = int_to_ptr.vmem [resolvable:$true] %s69_s30 }
   0xa   :  { %p4150_p1 = scmp.lt.u32.totalorder %s4146_s1, %s5612_s13 }
   0xc   :  { %p4152_p2 = pnand %p4150_p1, %p4147_p0 }
   0xe   :  { %4155 = shalt.err (!%p4152_p2)
}
   0xf   :  { %s4156_s25 = scalar_lea.vmem %s70_s30, 1024  ;;  %p4161_p4 = scmp.lt.s32.totalorder %s70_s30, %s70_s30 }
  0x10   :  { %p4157_p3 = scmp.ne.s32.totalorder %s70_s30, %s4156_s25  ;;  %p4162_p5 = scmp.lt.s32.totalorder %s4156_s25, %s4156_s25 }
  0x12   :  { %p4163_p6 = por %p4162_p5, %p4161_p4 }
  0x14   :  { %p4164_p7 = pnand %p4163_p6, %p4157_p3 }
  0x16   :  { %4167 = shalt.err (!%p4164_p7)
}
  0x17   :  { %s5622_s3 = smov 64   ;;  %s5623_s26 = smov 4  }
  0x18   :  { %75 = dma.hbm_to_vmem [thread:$0]  %s5612_s13, 1024, %s70_s30, [#allocation6], %s5622_s3, %s5622_s3, %s5623_s26  }
  0x19   :  { %s4267_s29 = smov [#allocation2]   ;;  %s4168_s1 = scalar_lea.hbm %s5607_s8, 8192 }
  0x1a   :  { %s49_s0 = sshll.u32 %s4267_s29, 4  ;;  %p4169_p8 = scmp.ne.s32.totalorder %s5607_s8, %s4168_s1  ;;  %s50_s0 = int_to_ptr.vmem [resolvable:$true] %s49_s0 }
  0x1b   :  { %p4172_p9 = scmp.lt.u32.totalorder %s4168_s1, %s5607_s8 }
  0x1d   :  { %p4174_p10 = pnand %p4172_p9, %p4169_p8 }
  0x1f   :  { %4177 = shalt.err (!%p4174_p10)
}
  0x20   :  { %s4178_s25 = scalar_lea.vmem %s50_s0, 8192  ;;  %p4183_p12 = scmp.lt.s32.totalorder %s50_s0, %s50_s0 }
  0x21   :  { %p4179_p11 = scmp.ne.s32.totalorder %s50_s0, %s4178_s25  ;;  %p4184_p13 = scmp.lt.s32.totalorder %s4178_s25, %s4178_s25 }
  0x23   :  { %p4185_p0 = por %p4184_p13, %p4183_p12 }
  0x25   :  { %p4186_p1 = pnand %p4185_p0, %p4179_p11 }
  0x27   :  { %4189 = shalt.err (!%p4186_p1)
}
  0x28   :  { %s4268_s13 = smov 128   ;;  %s4269_s30 = smov 8  }
  0x29   :  { %55 = dma.hbm_to_vmem [thread:$0]  %s5607_s8, 8192, %s50_s0, [#allocation3], %s4268_s13, %s4268_s13, %s4269_s30  }
  0x2a   :  { %s4270_s29 = smov [#allocation7]   ;;  %s4271_s21 = smov [#allocation8]  }
  0x2b   :  { %s87_s20 = sshll.u32 %s4270_s29, 4  ;;  %s100_s22 = sshll.u32 %s4271_s21, 4  ;;  %s88_s20 = int_to_ptr.vmem [resolvable:$true] %s87_s20  ;;  %s101_s22 = int_to_ptr.vmem [resolvable:$true] %s100_s22 }
  0x2c   :  { %s4190_s23 = scalar_lea.hbm %s5616_s17, 1024 }
  0x2d   :  { %p4191_p2 = scmp.ne.s32.totalorder %s5616_s17, %s4190_s23  ;;  %p4194_p3 = scmp.lt.u32.totalorder %s4190_s23, %s5616_s17 }
  0x2f   :  { %p4196_p4 = pnand %p4194_p3, %p4191_p2 }
  0x31   :  { %4199 = shalt.err (!%p4196_p4)
}
  0x32   :  { %s4200_s8 = scalar_lea.vmem %s88_s20, 1024  ;;  %p4205_p6 = scmp.lt.s32.totalorder %s88_s20, %s88_s20 }
  0x33   :  { %p4201_p5 = scmp.ne.s32.totalorder %s88_s20, %s4200_s8  ;;  %p4206_p7 = scmp.lt.s32.totalorder %s4200_s8, %s4200_s8 }
  0x35   :  { %p4207_p8 = por %p4206_p7, %p4205_p6 }
  0x37   :  { %p4208_p9 = pnand %p4207_p8, %p4201_p5 }
  0x39   :  { %4211 = shalt.err (!%p4208_p9)
}
  0x3a   :  { %s5628_s0 = smov 4   ;;  %s5629_s13 = smov 64  }
  0x3b   :  { %93 = dma.hbm_to_vmem [thread:$0]  %s5616_s17, 1024, %s88_s20, [#allocation6], %s5629_s13, %s5629_s13, %s5628_s0  }
  0x3c   :  { %s4212_s3 = scalar_lea.hbm %s5617_s18, 16 }
  0x3d   :  { %p4213_p10 = scmp.ne.s32.totalorder %s5617_s18, %s4212_s3  ;;  %p4216_p11 = scmp.lt.u32.totalorder %s4212_s3, %s5617_s18 }
  0x3f   :  { %p4218_p12 = pnand %p4216_p11, %p4213_p10 }
  0x41   :  { %4221 = shalt.err (!%p4218_p12)
}
  0x42   :  { %s4222_s23 = scalar_lea.vmem %s101_s22, 16  ;;  %s4226_s24 = scalar_lea.vmem %s101_s22, 32 }
  0x43   :  { %p4223_p13 = scmp.ne.s32.totalorder %s101_s22, %s4222_s23  ;;  %p4227_p0 = scmp.lt.s32.totalorder %s101_s22, %s101_s22 }
  0x44   :  { %p4228_p1 = scmp.lt.s32.totalorder %s4226_s24, %s4222_s23 }
  0x46   :  { %p4229_p2 = por %p4228_p1, %p4227_p0 }
  0x48   :  { %p4230_p3 = pnand %p4229_p2, %p4223_p13 }
  0x4a   :  { %4233 = shalt.err (!%p4230_p3)
}
  0x4b   :  { %103 = dma.hbm_to_vmem [thread:$0]  %s5617_s18, 16, %s101_s22, [#allocation9]  }
  0x4c   :  { %4256 = dma.done.wait [#allocation3], 8192  }
  0x4d   :  { %4257 = vsyncadd [#allocation3], 4294959104 }
  0x4e   :  { %4258 = dma.done.wait [#allocation6], 2048  }
  0x4f   :  { %4259 = vsyncadd [#allocation6], 4294965248 }
  0x50   :  { %4260 = dma.done.wait [#allocation9], 16  }
  0x51   :  { %4261 = vsyncadd [#allocation9], 4294967280  ;;  %v4272_v0 = vmov 0   ;;  %s5630_s0 = sld [smem:[#allocation16_spill]]  ;;  %s5631_s17 = sld [smem:[#allocation15_spill]]  ;;  %v4273_v25 = vmov 0.0   ;;  %v150_v26 = vlaneseq }
  0x52   :  { %318 = vmatprep.mubr.bf16.mxu0 %v4272_v0  ;;  %494 = vmatprep.mubr.f32.mxu1 %v4273_v25  ;;  %v3172_v28 = vld [vmem:[%s5603_s4 + $0x180] sm:$0xff]  ;;  %v3173_v29 = vld [vmem:[%s5603_s4 + $0x188] sm:$0xff]  ;;  %v3174_v34 = vld [vmem:[%s5603_s4 + $0x190] sm:$0xff]  ;;  %s5632_s28 = sld [smem:[#allocation17_spill]]  ;;  %s5633_s23 = sld [smem:[#allocation18_spill]]  ;;  %vm405_vm0 = vcmask 982016  }
  0x53   :  { %v4512_v27 = vshrl.u32 %v150_v26, 7  ;;  %v3156_v30 = vld [vmem:[%s5603_s4 + $0x100] sm:$0xff]  ;;  %v3761_v32 = vpack.c.bf16 %v3173_v29, %v3172_v28  ;;  %v3157_v33 = vld [vmem:[%s5603_s4 + $0x108] sm:$0xff]  ;;  %v3175_v35 = vld [vmem:[%s5603_s4 + $0x198] sm:$0xff]  ;;  %vm998_vm1 = vcmask 1046528   ;;  %vm1016_vm2 = vcmask 1043456  }
  0x54   :  { %v3763_v38 = vpack.c.bf16 %v3157_v33, %v3156_v30  ;;  %v3765_v39 = vpack.c.bf16 %v3175_v35, %v3174_v34  ;;  %v3158_v40 = vld [vmem:[%s5603_s4 + $0x110] sm:$0xff]  ;;  %v3159_v41 = vld [vmem:[%s5603_s4 + $0x118] sm:$0xff]  ;;  %vm1004_vm3 = vcmask 1045504   ;;  %vm1010_vm4 = vcmask 1044480   ;;  %s4276_s1 = smov [#allocation10]  }
  0x55   :  { %v152_v31 = vsub.s32 0, %v4512_v27  ;;  %v156_v37 = vsub.s32 1, %v4512_v27  ;;  %v3767_v42 = vpack.c.bf16 %v3159_v41, %v3158_v40  ;;  %vm1133_vm5 = vcmask 1042432   ;;  %s3097_s2 = sshll.u32 %s4276_s1, 4  ;;  %s3098_s2 = int_to_ptr.vmem [resolvable:$true] %s3097_s2 }
  0x56   :  { %vm1144_vm6 = vcmask 1040384   ;;  %vm4274_vm7 = vmmov 1   ;;  %vm1849_vm9 = vcmask 359424   ;;  %vm4275_vm10 = vmmov 0   ;;  %p4239_p5 = scmp.lt.s32.totalorder %s3098_s2, %s3098_s2 }
  0x57   :  { %v3934_v1 = vld [vmem:[%s5630_s0 + $0x4] ss:$8 sps:$4 sm:$0xff]   ;;  %v3936_v2 = vld [vmem:[%s5630_s0] ss:$8 sps:$4 sm:$0xff]   ;;  %v3937_v3 = vld [vmem:[%s5630_s0 + $0x14] ss:$8 sps:$4 sm:$0xff]  }
  0x58   :  { %286 = vmatprep.subr.bf16.mxu0 %v3934_v1  ;;  %v3939_v4 = vld [vmem:[%s5630_s0 + $0x10] ss:$8 sps:$4 sm:$0xff]   ;;  %v3940_v5 = vld [vmem:[%s5630_s0 + $0x24] ss:$8 sps:$4 sm:$0xff]   ;;  %v3942_v6 = vld [vmem:[%s5630_s0 + $0x20] ss:$8 sps:$4 sm:$0xff]  }
  0x59   :  { %287 = vmatpush1.bf16.msra.mxu0 %v3936_v2  ;;  %v3943_v7 = vld [vmem:[%s5630_s0 + $0x34] ss:$8 sps:$4 sm:$0xff]   ;;  %v3945_v8 = vld [vmem:[%s5630_s0 + $0x30] ss:$8 sps:$4 sm:$0xff]   ;;  %v3946_v9 = vld [vmem:[%s5630_s0 + $0x44] ss:$8 sps:$4 sm:$0xff]  }
  0x5a   :  { %288 = vmatprep.subr.bf16.mxu0 %v3937_v3  ;;  %v3948_v10 = vld [vmem:[%s5630_s0 + $0x40] ss:$8 sps:$4 sm:$0xff]   ;;  %v3949_v11 = vld [vmem:[%s5630_s0 + $0x54] ss:$8 sps:$4 sm:$0xff]   ;;  %v3951_v12 = vld [vmem:[%s5630_s0 + $0x50] ss:$8 sps:$4 sm:$0xff]  }
  0x5b   :  { %v3952_v13 = vld [vmem:[%s5630_s0 + $0x64] ss:$8 sps:$4 sm:$0xff]   ;;  %v3954_v14 = vld [vmem:[%s5630_s0 + $0x60] ss:$8 sps:$4 sm:$0xff]   ;;  %v3955_v15 = vld [vmem:[%s5630_s0 + $0x74] ss:$8 sps:$4 sm:$0xff]  }
  0x5c   :  { %v3957_v16 = vld [vmem:[%s5630_s0 + $0x70] ss:$8 sps:$4 sm:$0xff]   ;;  %v3958_v17 = vld [vmem:[%s5631_s17] sm:$0xff]   ;;  %v3959_v18 = vld [vmem:[%s5631_s17 + $0x8] sm:$0xff]   ;;  %vm2325_vm11 = vcmask 1041408   ;;  %vm3089_vm12 = vcmask 93184  }
  0x5d   :  { %289 = vmatpush1.bf16.msra.mxu0 %v3939_v4  ;;  %v3960_v19 = vld [vmem:[%s5631_s17 + $0x10] sm:$0xff]   ;;  %v3961_v20 = vld [vmem:[%s5631_s17 + $0x18] sm:$0xff]   ;;  %v3962_v21 = vld [vmem:[%s5631_s17 + $0x20] sm:$0xff]  }
  0x5e   :  { %290 = vmatprep.subr.bf16.mxu0 %v3940_v5  ;;  %v3963_v22 = vld [vmem:[%s5631_s17 + $0x28] sm:$0xff]   ;;  %v3964_v23 = vld [vmem:[%s5631_s17 + $0x30] sm:$0xff]   ;;  %v3965_v24 = vld [vmem:[%s5631_s17 + $0x38] ss:$0 sps:$4 sm:$0xff]  }
  0x5f   :  { %v148_v36 = vld [vmem:[%s5632_s28] sm:$0x3]  ;;  %vm5352_vm8 = vmpackc.low %vm1016_vm2, %vm4274_vm7 }
  0x60   :  { %v4545_v43 = vrot.slane %v148_v36, %v152_v31  ;;  %v4549_v45 = vrot.slane %v148_v36, %v156_v37 }
  0x61   :  { %291 = vmatpush1.bf16.msra.mxu0 %v3942_v6 }
  0x62   :  { %292 = vmatprep.subr.bf16.mxu0 %v3943_v7 }
  0x65   :  { %293 = vmatpush1.bf16.msra.mxu0 %v3945_v8 }
  0x66   :  { %294 = vmatprep.subr.bf16.mxu0 %v3946_v9 }
  0x69   :  { %295 = vmatpush1.bf16.msra.mxu0 %v3948_v10 }
  0x6a   :  { %296 = vmatprep.subr.bf16.mxu0 %v3949_v11 }
  0x6d   :  { %297 = vmatpush1.bf16.msra.mxu0 %v3951_v12 }
  0x6e   :  { %298 = vmatprep.subr.bf16.mxu0 %v3952_v13 }
  0x71   :  { %299 = vmatpush1.bf16.msra.mxu0 %v3954_v14 }
  0x72   :  { %300 = vmatprep.subr.bf16.mxu0 %v3955_v15 }
  0x75   :  { %301 = vmatpush1.bf16.msra.mxu0 %v3957_v16 }
  0x76   :  { %3762 = vmatprep.subr.bf16.mxu0 %v3761_v32 }
  0x78   :  { %319 = vmatmul.mubr.bf16.vlgmr.msra.gmra.mrb[0].mxu0 %v3958_v17 }
  0x79   :  { %328 = vmatprep.mubr.bf16.mxu0 %v4272_v0  ;;  %3764 = vmatpush3.bf16.msra.mxu0 %v3763_v38 }
  0x7a   :  { %3766 = vmatprep.subr.bf16.mxu0 %v3765_v39 }
  0x7d   :  { %3768 = vmatpush3.bf16.msra.mxu0 %v3767_v42 }
  0x80   :  { %329 = vmatmul.mubr.bf16.gmra.mrb[4].mxu0 %v3959_v18 }
  0x81   :  { %338 = vmatprep.mubr.bf16.mxu0 %v4272_v0 }
  0x88   :  { %339 = vmatmul.mubr.bf16.gmra.mrb[8].mxu0 %v3960_v19 }
  0x89   :  { %348 = vmatprep.mubr.bf16.mxu0 %v4272_v0 }
  0x90   :  { %349 = vmatmul.mubr.bf16.gmra.mrb[12].mxu0 %v3961_v20 }
  0x91   :  { %358 = vmatprep.mubr.bf16.mxu0 %v4272_v0 }
  0x98   :  { %359 = vmatmul.mubr.bf16.gmra.mrb[16].mxu0 %v3962_v21 }
  0x99   :  { %368 = vmatprep.mubr.bf16.mxu0 %v4272_v0 }
  0xa0   :  { %369 = vmatmul.mubr.bf16.gmra.mrb[20].mxu0 %v3963_v22 }
  0xa1   :  { %378 = vmatprep.mubr.bf16.mxu0 %v4272_v0 }
  0xa8   :  { %379 = vmatmul.mubr.bf16.gmra.mrb[24].mxu0 %v3964_v23 }
  0xa9   :  { %388 = vmatprep.mubr.bf16.mxu0 %v4272_v0 }
  0xb0   :  { %389 = vmatmul.mubr.bf16.gmra.mrb[28].mxu0 %v3965_v24 }
 0x14b   :  { %v320_v44 = vpop.f32.mrb[0].mxu0 }
 0x14c   :  { %v322_v46 = vpop.f32.mrb[1].mxu0  ;;  %v321_v48 = vadd.f32 %v320_v44, %v4545_v43 }
 0x14d   :  { %v324_v47 = vpop.f32.mrb[2].mxu0  ;;  %v323_v51 = vadd.f32 %v322_v46, %v4549_v45 }
 0x14e   :  { %v325_v49 = vadd.f32 %v324_v47, %v4545_v43  ;;  %v326_v50 = vpop.f32.mrb[3].mxu0 }
 0x14f   :  { %v327_v52 = vadd.f32 %v326_v50, %v4549_v45 }
 0x150   :  { %v4555_v53 = vpack.c.bf16 %v325_v49, %v321_v48 }
 0x151   :  { %v4557_v54 = vpack.c.bf16 %v327_v52, %v323_v51 }
 0x153   :  { %v330_v55 = vpop.f32.mrb[4].mxu0  ;;  %3674 = vmatprep.subr.bf16.mxu1 %v4557_v54 }
 0x154   :  { %v332_v56 = vpop.f32.mrb[5].mxu0  ;;  %3676 = vmatpush1.bf16.msra.mxu1 %v4555_v53  ;;  %v331_v58 = vadd.f32 %v330_v55, %v4545_v43 }
 0x155   :  { %v334_v57 = vpop.f32.mrb[6].mxu0  ;;  %v333_v61 = vadd.f32 %v332_v56, %v4549_v45 }
 0x156   :  { %v335_v59 = vadd.f32 %v334_v57, %v4545_v43  ;;  %v336_v60 = vpop.f32.mrb[7].mxu0 }
 0x157   :  { %v337_v62 = vadd.f32 %v336_v60, %v4549_v45 }
 0x158   :  { %v4565_v63 = vpack.c.bf16 %v335_v59, %v331_v58 }
 0x159   :  { %v4567_v1 = vpack.c.bf16 %v337_v62, %v333_v61 }
 0x15b   :  { %v340_v2 = vpop.f32.mrb[8].mxu0  ;;  %3678 = vmatprep.subr.bf16.mxu1 %v4567_v1 }
 0x15c   :  { %v342_v3 = vpop.f32.mrb[9].mxu0  ;;  %3680 = vmatpush1.bf16.msra.mxu1 %v4565_v63  ;;  %v341_v5 = vadd.f32 %v340_v2, %v4545_v43 }
 0x15d   :  { %v344_v4 = vpop.f32.mrb[10].mxu0  ;;  %v343_v8 = vadd.f32 %v342_v3, %v4549_v45 }
 0x15e   :  { %v345_v6 = vadd.f32 %v344_v4, %v4545_v43  ;;  %v346_v7 = vpop.f32.mrb[11].mxu0 }
 0x15f   :  { %v347_v9 = vadd.f32 %v346_v7, %v4549_v45  ;;  %v3140_v7 = vld [vmem:[%s5633_s23 + $0x40] sm:$0xff] }
 0x160   :  { %v4575_v10 = vpack.c.bf16 %v345_v6, %v341_v5  ;;  %v397_v5 = vld [vmem:[%s5633_s23] sm:$0xff]  ;;  %v404_v6 = vld [vmem:[%s5633_s23 + $0x38] sm:$0xf] }
 0x161   :  { %v4577_v11 = vpack.c.bf16 %v347_v9, %v343_v8  ;;  %v3141_v8 = vld [vmem:[%s5633_s23 + $0x48] sm:$0xff]  ;;  %v3142_v9 = vld [vmem:[%s5633_s23 + $0x50] sm:$0xff] }
 0x163   :  { %v350_v12 = vpop.f32.mrb[12].mxu0  ;;  %3682 = vmatprep.subr.bf16.mxu1 %v4577_v11 }
 0x164   :  { %v352_v13 = vpop.f32.mrb[13].mxu0  ;;  %3684 = vmatpush1.bf16.msra.mxu1 %v4575_v10  ;;  %v351_v15 = vadd.f32 %v350_v12, %v4545_v43  ;;  %v3145_v12 = vld [vmem:[%s5633_s23 + $0x68] sm:$0xff] }
 0x165   :  { %v354_v14 = vpop.f32.mrb[14].mxu0  ;;  %v353_v18 = vadd.f32 %v352_v13, %v4549_v45  ;;  %v3146_v13 = vld [vmem:[%s5633_s23 + $0x70] sm:$0xff] }
 0x166   :  { %v355_v16 = vadd.f32 %v354_v14, %v4545_v43  ;;  %v356_v17 = vpop.f32.mrb[15].mxu0  ;;  %v3147_v14 = vld [vmem:[%s5633_s23 + $0x78] sm:$0xf] }
 0x167   :  { %v357_v19 = vadd.f32 %v356_v17, %v4549_v45  ;;  %v3160_v17 = vld [vmem:[%s5603_s4 + $0x120] sm:$0xff] }
 0x168   :  { %v4585_v20 = vpack.c.bf16 %v355_v16, %v351_v15  ;;  %v3176_v15 = vld [vmem:[%s5603_s4 + $0x1a0] sm:$0xff]  ;;  %v3177_v16 = vld [vmem:[%s5603_s4 + $0x1a8] sm:$0xff] }
 0x169   :  { %v4587_v21 = vpack.c.bf16 %v357_v19, %v353_v18  ;;  %v3769_v18 = vpack.c.bf16 %v3177_v16, %v3176_v15  ;;  %v3161_v19 = vld [vmem:[%s5603_s4 + $0x128] sm:$0xff]  ;;  %v733_v16 = vld [vmem:[%s5603_s4 + $0xe0] sm:$0xff] }
 0x16b   :  { %v360_v22 = vpop.f32.mrb[16].mxu0  ;;  %3686 = vmatprep.subr.bf16.mxu1 %v4587_v21  ;;  %3770 = vmatprep.subr.bf16.mxu0 %v3769_v18  ;;  %v3184_v18 = vld [vmem:[%s5603_s4 + $0x1e0] sm:$0xff] }
 0x16c   :  { %v362_v23 = vpop.f32.mrb[17].mxu0  ;;  %3688 = vmatpush1.bf16.msra.mxu1 %v4585_v20  ;;  %v361_v26 = vadd.f32 %v360_v22, %v4545_v43  ;;  %v3771_v22 = vpack.c.bf16 %v3161_v19, %v3160_v17  ;;  %v734_v17 = vld [vmem:[%s5603_s4 + $0xe8] sm:$0xff] }
 0x16d   :  { %v364_v24 = vpop.f32.mrb[18].mxu0  ;;  %v363_v30 = vadd.f32 %v362_v23, %v4549_v45  ;;  %v3753_v19 = vpack.c.bf16 %v734_v17, %v733_v16 }
 0x16e   :  { %v365_v28 = vadd.f32 %v364_v24, %v4545_v43  ;;  %v366_v29 = vpop.f32.mrb[19].mxu0  ;;  %v705_v24 = vld [vmem:[%s5603_s4] sm:$0xff]  ;;  %3772 = vmatpush3.bf16.msra.mxu0 %v3771_v22  ;;  %v718_v22 = vld [vmem:[%s5603_s4 + $0x68] sm:$0xff] }
 0x16f   :  { %v367_v32 = vadd.f32 %v366_v29, %v4549_v45  ;;  %v723_v29 = vld [vmem:[%s5603_s4 + $0x90] sm:$0xff] }
 0x170   :  { %v3691_v33 = vpack.c.bf16 %v365_v28, %v361_v26  ;;  %v706_v26 = vld [vmem:[%s5603_s4 + $0x8] sm:$0xff] }
 0x171   :  { %v3689_v34 = vpack.c.bf16 %v367_v32, %v363_v30  ;;  %v3731_v28 = vpack.c.bf16 %v706_v26, %v705_v24  ;;  %v724_v30 = vld [vmem:[%s5603_s4 + $0x98] sm:$0xff]  ;;  %v3168_v26 = vld [vmem:[%s5603_s4 + $0x160] sm:$0xff] }
 0x172   :  { %v3733_v32 = vpack.c.bf16 %v724_v30, %v723_v29  ;;  %v735_v30 = vld [vmem:[%s5603_s4 + $0xf0] sm:$0xff] }
 0x173   :  { %v370_v35 = vpop.f32.mrb[20].mxu0  ;;  %3690 = vmatprep.subr.bf16.mxu1 %v3689_v34 }
 0x174   :  { %v372_v36 = vpop.f32.mrb[21].mxu0  ;;  %3692 = vmatpush1.bf16.msra.mxu1 %v3691_v33  ;;  %v371_v39 = vadd.f32 %v370_v35, %v4545_v43 }
 0x175   :  { %v374_v38 = vpop.f32.mrb[22].mxu0  ;;  %v373_v42 = vadd.f32 %v372_v36, %v4549_v45  ;;  %v3178_v36 = vld [vmem:[%s5603_s4 + $0x1b0] sm:$0xff] }
 0x176   :  { %v375_v40 = vadd.f32 %v374_v38, %v4545_v43  ;;  %v376_v41 = vpop.f32.mrb[23].mxu0  ;;  %v3179_v38 = vld [vmem:[%s5603_s4 + $0x1b8] sm:$0xff] }
 0x177   :  { %v377_v44 = vadd.f32 %v376_v41, %v4549_v45  ;;  %v3163_v41 = vld [vmem:[%s5603_s4 + $0x138] sm:$0xff] }
 0x178   :  { %v3695_v46 = vpack.c.bf16 %v375_v40, %v371_v39  ;;  %v3162_v39 = vld [vmem:[%s5603_s4 + $0x130] sm:$0xff]  ;;  %v3773_v40 = vpack.c.bf16 %v3179_v38, %v3178_v36  ;;  %v720_v38 = vld [vmem:[%s5603_s4 + $0x78] sm:$0xff] }
 0x179   :  { %v3693_v47 = vpack.c.bf16 %v377_v44, %v373_v42  ;;  %v725_v42 = vld [vmem:[%s5603_s4 + $0xa0] sm:$0xff]  ;;  %v726_v44 = vld [vmem:[%s5603_s4 + $0xa8] sm:$0xff]  ;;  %v719_v36 = vld [vmem:[%s5603_s4 + $0x70] sm:$0xff] }
 0x17a   :  { %3774 = vmatprep.subr.bf16.mxu0 %v3773_v40  ;;  %v3759_v40 = vpack.c.bf16 %v720_v38, %v719_v36  ;;  %v3986_v36 = vld [vmem:[%s5604_s5 + $0x64] ss:$8 sps:$4 sm:$0xff]  }
 0x17b   :  { %v380_v48 = vpop.f32.mrb[24].mxu0  ;;  %3694 = vmatprep.subr.bf16.mxu1 %v3693_v47 }
 0x17c   :  { %v382_v49 = vpop.f32.mrb[25].mxu0  ;;  %3696 = vmatpush1.bf16.msra.mxu1 %v3695_v46  ;;  %v381_v51 = vadd.f32 %v380_v48, %v4545_v43  ;;  %v709_v48 = vld [vmem:[%s5603_s4 + $0x20] sm:$0xff] }
 0x17d   :  { %v384_v50 = vpop.f32.mrb[26].mxu0  ;;  %v383_v56 = vadd.f32 %v382_v49, %v4549_v45  ;;  %v710_v49 = vld [vmem:[%s5603_s4 + $0x28] sm:$0xff] }
 0x17e   :  { %v385_v52 = vadd.f32 %v384_v50, %v4545_v43  ;;  %v386_v55 = vpop.f32.mrb[27].mxu0  ;;  %v3739_v50 = vpack.c.bf16 %v710_v49, %v709_v48 }
 0x17f   :  { %v387_v57 = vadd.f32 %v386_v55, %v4549_v45 }
 0x180   :  { %v3699_v58 = vpack.c.bf16 %v385_v52, %v381_v51  ;;  %v727_v51 = vld [vmem:[%s5603_s4 + $0xb0] sm:$0xff]  ;;  %v728_v52 = vld [vmem:[%s5603_s4 + $0xb8] sm:$0xff] }
 0x181   :  { %v3697_v59 = vpack.c.bf16 %v387_v57, %v383_v56  ;;  %v3741_v55 = vpack.c.bf16 %v728_v52, %v727_v51  ;;  %v711_v56 = vld [vmem:[%s5603_s4 + $0x30] sm:$0xff]  ;;  %v712_v57 = vld [vmem:[%s5603_s4 + $0x38] sm:$0xff] }
 0x183   :  { %v390_v60 = vpop.f32.mrb[28].mxu0  ;;  %3698 = vmatprep.subr.bf16.mxu1 %v3697_v59 }
 0x184   :  { %v392_v61 = vpop.f32.mrb[29].mxu0  ;;  %3700 = vmatpush1.bf16.msra.mxu1 %v3699_v58  ;;  %v391_v3 = vadd.f32 %v390_v60, %v4545_v43  ;;  %v398_v43 = vld [vmem:[%s5633_s23 + $0x8] sm:$0xff] }
 0x185   :  { %v393_v62 = vadd.f32 %v392_v61, %v4549_v45  ;;  %v394_v2 = vpop.f32.mrb[30].mxu0  ;;  %v399_v45 = vld [vmem:[%s5633_s23 + $0x10] sm:$0xff]  ;;  %v3181_v60 = vld [vmem:[%s5603_s4 + $0x1c8] sm:$0xff]  ;;  %v3164_v61 = vld [vmem:[%s5603_s4 + $0x140] sm:$0xff] }
 0x186   :  { %v395_v4 = vpop.f32.mrb[31].mxu0  ;;  %v3165_v2 = vld [vmem:[%s5603_s4 + $0x148] sm:$0xff] }
 0x187   :  { %458 = vmatprep.subr.mxu1 %v393_v62  ;;  %v730_v4 = vld [vmem:[%s5603_s4 + $0xc8] sm:$0xff] }
 0x188   :  { %459 = vmatpush1.msra.mxu1 %v391_v3 }
 0x189   :  { %3132 = vmatmul.mubr.msk.f32.vlgmr.msra.gmra.mrb[0].mxu1 %vm405_vm0, %v397_v5  ;;  %3702 = vmatprep.subr.bf16.mxu1 %v4557_v54  ;;  %v401_v54 = vld [vmem:[%s5633_s23 + $0x20] sm:$0xff]  ;;  %v3779_v5 = vpack.c.bf16 %v3165_v2, %v3164_v61 }
 0x18a   :  { %3704 = vmatpush1.bf16.msra.mxu1 %v4555_v53  ;;  %500 = vmatprep.mubr.f32.mxu1 %v4273_v25  ;;  %v400_v53 = vld [vmem:[%s5633_s23 + $0x18] sm:$0xff] }
 0x18b   :  { %3706 = vmatprep.subr.bf16.mxu1 %v4567_v1  ;;  %v403_v1 = vld [vmem:[%s5633_s23 + $0x30] sm:$0xff] }
 0x18d   :  { %3133 = vmatmul.mubr.msk.f32.gmra.mrb[2].mxu1 %vm405_vm0, %v398_v43 }
 0x18e   :  { %3708 = vmatpush1.bf16.msra.mxu1 %v4565_v63  ;;  %506 = vmatprep.mubr.f32.mxu1 %v4273_v25  ;;  %v402_v63 = vld [vmem:[%s5633_s23 + $0x28] sm:$0xff] }
 0x18f   :  { %3710 = vmatprep.subr.bf16.mxu1 %v4577_v11  ;;  %v3144_v11 = vld [vmem:[%s5633_s23 + $0x60] sm:$0xff] }
 0x191   :  { %3134 = vmatmul.mubr.msk.f32.gmra.mrb[4].mxu1 %vm405_vm0, %v399_v45  ;;  %v713_v45 = vld [vmem:[%s5603_s4 + $0x40] sm:$0xff] }
 0x192   :  { %3712 = vmatpush1.bf16.msra.mxu1 %v4575_v10  ;;  %512 = vmatprep.mubr.f32.mxu1 %v4273_v25  ;;  %v3143_v10 = vld [vmem:[%s5633_s23 + $0x58] sm:$0xff] }
 0x193   :  { %3714 = vmatprep.subr.bf16.mxu1 %v4587_v21  ;;  %v722_v21 = vld [vmem:[%s5603_s4 + $0x88] sm:$0xff] }
 0x195   :  { %3135 = vmatmul.mubr.msk.f32.gmra.mrb[6].mxu1 %vm405_vm0, %v400_v53  ;;  %v714_v53 = vld [vmem:[%s5603_s4 + $0x48] sm:$0xff] }
 0x196   :  { %3716 = vmatpush1.bf16.msra.mxu1 %v4585_v20  ;;  %518 = vmatprep.mubr.f32.mxu1 %v4273_v25  ;;  %v721_v20 = vld [vmem:[%s5603_s4 + $0x80] sm:$0xff] }
 0x197   :  { %3718 = vmatprep.subr.bf16.mxu1 %v3689_v34  ;;  %v3729_v23 = vpack.c.bf16 %v722_v21, %v721_v20  ;;  %v708_v34 = vld [vmem:[%s5603_s4 + $0x18] sm:$0xff]  ;;  %v3185_v20 = vld [vmem:[%s5603_s4 + $0x1e8] sm:$0xff]  ;;  %v717_v21 = vld [vmem:[%s5603_s4 + $0x60] sm:$0xff] }
 0x198   :  { %v3755_v24 = vpack.c.bf16 %v718_v22, %v717_v21  ;;  %v3980_v21 = vld [vmem:[%s5604_s5 + $0x44] ss:$8 sps:$4 sm:$0xff]  }
 0x199   :  { %3136 = vmatmul.mubr.msk.f32.gmra.mrb[8].mxu1 %vm405_vm0, %v401_v54  ;;  %v3747_v54 = vpack.c.bf16 %v714_v53, %v713_v45  ;;  %v3966_v53 = vld [vmem:[%s5604_s5] ss:$8 sps:$4 sm:$0xff]  }
 0x19a   :  { %3720 = vmatpush1.bf16.msra.mxu1 %v3691_v33  ;;  %524 = vmatprep.mubr.f32.mxu1 %v4273_v25  ;;  %v707_v33 = vld [vmem:[%s5603_s4 + $0x10] sm:$0xff] }
 0x19b   :  { %3722 = vmatprep.subr.bf16.mxu1 %v3693_v47  ;;  %v3735_v35 = vpack.c.bf16 %v708_v34, %v707_v33  ;;  %v3737_v47 = vpack.c.bf16 %v726_v44, %v725_v42  ;;  %v3186_v33 = vld [vmem:[%s5603_s4 + $0x1f0] sm:$0xff]  ;;  %v3171_v42 = vld [vmem:[%s5603_s4 + $0x178] sm:$0xff] }
 0x19d   :  { %3137 = vmatmul.mubr.msk.f32.gmra.mrb[10].mxu1 %vm405_vm0, %v402_v63  ;;  %v731_v63 = vld [vmem:[%s5603_s4 + $0xd0] sm:$0xff] }
 0x19e   :  { %3724 = vmatpush1.bf16.msra.mxu1 %v3695_v46  ;;  %530 = vmatprep.mubr.f32.mxu1 %v4273_v25  ;;  %v3775_v46 = vpack.c.bf16 %v3163_v41, %v3162_v39  ;;  %v3170_v41 = vld [vmem:[%s5603_s4 + $0x170] sm:$0xff] }
 0x19f   :  { %3726 = vmatprep.subr.bf16.mxu1 %v3697_v59  ;;  %v3180_v59 = vld [vmem:[%s5603_s4 + $0x1c0] sm:$0xff]  ;;  %v3791_v44 = vpack.c.bf16 %v3171_v42, %v3170_v41 }
 0x1a0   :  { %3776 = vmatpush3.bf16.msra.mxu0 %v3775_v46  ;;  %v3968_v46 = vld [vmem:[%s5604_s5 + $0x4] ss:$8 sps:$4 sm:$0xff]   ;;  %v3984_v42 = vld [vmem:[%s5604_s5 + $0x60] ss:$8 sps:$4 sm:$0xff]  }
 0x1a1   :  { %3138 = vmatmul.mubr.msk.f32.gmra.mrb[12].mxu1 %vm405_vm0, %v403_v1  ;;  %v732_v1 = vld [vmem:[%s5603_s4 + $0xd8] sm:$0xff] }
 0x1a2   :  { %3728 = vmatpush1.bf16.msra.mxu1 %v3699_v58  ;;  %536 = vmatprep.mubr.f32.mxu1 %v4273_v25  ;;  %v3743_v58 = vpack.c.bf16 %v712_v57, %v711_v56 }
 0x1a3   :  { %604 = vmatprep.subr.mxu1 %v393_v62  ;;  %v3777_v62 = vpack.c.bf16 %v3181_v60, %v3180_v59 }
 0x1a5   :  { %3139 = vmatmul.mubr.msk.f32.gmra.mrb[14].mxu1 %vm405_vm0, %v404_v6  ;;  %3778 = vmatprep.subr.bf16.mxu0 %v3777_v62  ;;  %v3182_v6 = vld [vmem:[%s5603_s4 + $0x1d0] sm:$0xff] }
 0x1a6   :  { %605 = vmatpush1.msra.mxu1 %v391_v3  ;;  %640 = vmatprep.mubr.f32.mxu1 %v4273_v25  ;;  %v729_v3 = vld [vmem:[%s5603_s4 + $0xc0] sm:$0xff] }
 0x1a7   :  { %3730 = vmatprep.subr.bf16.mxu1 %v3729_v23  ;;  %v3745_v43 = vpack.c.bf16 %v730_v4, %v729_v3  ;;  %3780 = vmatpush3.bf16.msra.mxu0 %v3779_v5  ;;  %v3785_v23 = vpack.c.bf16 %v3185_v20, %v3184_v18  ;;  %v3975_v20 = vld [vmem:[%s5604_s5 + $0x30] ss:$8 sps:$4 sm:$0xff]  }
 0x1a9   :  { %3148 = vmatmul.mubr.msk.f32.vlgmr.msra.gmra.mrb[16].mxu1 %vm405_vm0, %v3140_v7  ;;  %v3749_v7 = vpack.c.bf16 %v732_v1, %v731_v63 }
 0x1aa   :  { %646 = vmatprep.mubr.f32.mxu1 %v4273_v25  ;;  %3732 = vmatpush3.bf16.msra.mxu1 %v3731_v28  ;;  %v3169_v28 = vld [vmem:[%s5603_s4 + $0x168] sm:$0xff] }
 0x1ab   :  { %3734 = vmatprep.subr.bf16.mxu1 %v3733_v32  ;;  %v3787_v29 = vpack.c.bf16 %v3169_v28, %v3168_v26  ;;  %v736_v32 = vld [vmem:[%s5603_s4 + $0xf8] sm:$0xff]  ;;  %v3978_v28 = vld [vmem:[%s5604_s5 + $0x40] ss:$8 sps:$4 sm:$0xff]  }
 0x1ac   :  { %v3757_v34 = vpack.c.bf16 %v736_v32, %v735_v30 }
 0x1ad   :  { %3149 = vmatmul.mubr.msk.f32.gmra.mrb[18].mxu1 %vm405_vm0, %v3141_v8  ;;  %v3183_v8 = vld [vmem:[%s5603_s4 + $0x1d8] sm:$0xff] }
 0x1ae   :  { %652 = vmatprep.mubr.f32.mxu1 %v4273_v25  ;;  %3736 = vmatpush3.bf16.msra.mxu1 %v3735_v35  ;;  %v3187_v35 = vld [vmem:[%s5603_s4 + $0x1f8] sm:$0xff] }
 0x1af   :  { %3738 = vmatprep.subr.bf16.mxu1 %v3737_v47  ;;  %v3789_v39 = vpack.c.bf16 %v3187_v35, %v3186_v33  ;;  %v3981_v35 = vld [vmem:[%s5604_s5 + $0x50] ss:$8 sps:$4 sm:$0xff]  }
 0x1b1   :  { %3150 = vmatmul.mubr.msk.f32.gmra.mrb[20].mxu1 %vm405_vm0, %v3142_v9  ;;  %v715_v9 = vld [vmem:[%s5603_s4 + $0x50] sm:$0xff] }
 0x1b2   :  { %658 = vmatprep.mubr.f32.mxu1 %v4273_v25  ;;  %3740 = vmatpush3.bf16.msra.mxu1 %v3739_v50 }
 0x1b3   :  { %3742 = vmatprep.subr.bf16.mxu1 %v3741_v55 }
 0x1b5   :  { %3151 = vmatmul.mubr.msk.f32.gmra.mrb[22].mxu1 %vm405_vm0, %v3143_v10  ;;  %v716_v10 = vld [vmem:[%s5603_s4 + $0x58] sm:$0xff] }
 0x1b6   :  { %664 = vmatprep.mubr.f32.mxu1 %v4273_v25  ;;  %3744 = vmatpush3.bf16.msra.mxu1 %v3743_v58 }
 0x1b7   :  { %3746 = vmatprep.subr.bf16.mxu1 %v3745_v43 }
 0x1b9   :  { %3152 = vmatmul.mubr.msk.f32.gmra.mrb[24].mxu1 %vm405_vm0, %v3144_v11  ;;  %v3781_v11 = vpack.c.bf16 %v3183_v8, %v3182_v6  ;;  %v3969_v8 = vld [vmem:[%s5604_s5 + $0x10] ss:$8 sps:$4 sm:$0xff]  }
 0x1ba   :  { %670 = vmatprep.mubr.f32.mxu1 %v4273_v25  ;;  %3748 = vmatpush3.bf16.msra.mxu1 %v3747_v54  ;;  %v3971_v54 = vld [vmem:[%s5604_s5 + $0x14] ss:$8 sps:$4 sm:$0xff]  }
 0x1bb   :  { %3750 = vmatprep.subr.bf16.mxu1 %v3749_v7  ;;  %3782 = vmatprep.subr.bf16.mxu0 %v3781_v11 }
 0x1bd   :  { %3153 = vmatmul.mubr.msk.f32.gmra.mrb[26].mxu1 %vm405_vm0, %v3145_v12  ;;  %v3751_v12 = vpack.c.bf16 %v716_v10, %v715_v9  ;;  %v3974_v9 = vld [vmem:[%s5604_s5 + $0x24] ss:$8 sps:$4 sm:$0xff]  }
 0x1be   :  { %676 = vmatprep.mubr.f32.mxu1 %v4273_v25 }
 0x1bf   :  { %3752 = vmatpush3.bf16.msra.mxu1 %v3751_v12 }
 0x1c0   :  { %3754 = vmatprep.subr.bf16.mxu1 %v3753_v19 }
 0x1c1   :  { %3154 = vmatmul.mubr.msk.f32.gmra.mrb[28].mxu1 %vm405_vm0, %v3146_v13  ;;  %v3166_v13 = vld [vmem:[%s5603_s4 + $0x150] sm:$0xff] }
 0x1c2   :  { %682 = vmatprep.mubr.f32.mxu1 %v4273_v25 }
 0x1c3   :  { %3756 = vmatpush3.bf16.msra.mxu1 %v3755_v24 }
 0x1c4   :  { %3758 = vmatprep.subr.bf16.mxu1 %v3757_v34 }
 0x1c5   :  { %3155 = vmatmul.mubr.msk.f32.gmra.mrb[30].mxu1 %vm405_vm0, %v3147_v14  ;;  %v3167_v14 = vld [vmem:[%s5603_s4 + $0x158] sm:$0xff] }
 0x1c6   :  { %v3783_v15 = vpack.c.bf16 %v3167_v14, %v3166_v13  ;;  %v3972_v14 = vld [vmem:[%s5604_s5 + $0x20] ss:$8 sps:$4 sm:$0xff]  }
 0x1c7   :  { %3760 = vmatpush3.bf16.msra.mxu1 %v3759_v40 }
 0x1c8   :  { %3784 = vmatpush3.bf16.msra.mxu0 %v3783_v15  ;;  %1657 = vmatprep.subr.bf16.mxu1 %v3968_v46  ;;  %v3977_v15 = vld [vmem:[%s5604_s5 + $0x34] ss:$8 sps:$4 sm:$0xff]  }
 0x1c9   :  { %3786 = vmatprep.subr.bf16.mxu0 %v3785_v23 }
 0x1cc   :  { %3788 = vmatpush3.bf16.msra.mxu0 %v3787_v29  ;;  %v3983_v29 = vld [vmem:[%s5604_s5 + $0x54] ss:$8 sps:$4 sm:$0xff]  }
 0x1cd   :  { %3790 = vmatprep.subr.bf16.mxu0 %v3789_v39 }
 0x1d0   :  { %3792 = vmatpush3.bf16.msra.mxu0 %v3791_v44  ;;  %v3989_v44 = vld [vmem:[%s5604_s5 + $0x74] ss:$8 sps:$4 sm:$0xff]  }
 0x25c   :  { %v496_v47 = vpop.f32.mrb[0].mxu1 }
 0x25d   :  { %v498_v48 = vpop.f32.mrb[1].mxu1 }
 0x260   :  { %v502_v49 = vpop.f32.mrb[2].mxu1 }
 0x261   :  { %v504_v50 = vpop.f32.mrb[3].mxu1 }
 0x264   :  { %v508_v51 = vpop.f32.mrb[4].mxu1 }
 0x265   :  { %v510_v52 = vpop.f32.mrb[5].mxu1 }
 0x268   :  { %v514_v55 = vpop.f32.mrb[6].mxu1 }
 0x269   :  { %v516_v56 = vpop.f32.mrb[7].mxu1 }
 0x26c   :  { %v520_v57 = vpop.f32.mrb[8].mxu1 }
 0x26d   :  { %v522_v58 = vpop.f32.mrb[9].mxu1 }
 0x270   :  { %v4863_v59 = vpop.f32.mrb[10].mxu1 }
 0x271   :  { %v4865_v60 = vpop.f32.mrb[11].mxu1 }
 0x274   :  { %v4867_v61 = vpop.f32.mrb[12].mxu1 }
 0x275   :  { %v4869_v62 = vpop.f32.mrb[13].mxu1 }
 0x278   :  { %v4871_v2 = vpop.f32.mrb[14].mxu1 }
 0x279   :  { %v4873_v3 = vpop.f32.mrb[15].mxu1 }
 0x27c   :  { %v642_v4 = vpop.f32.mrb[16].mxu1 }
 0x27d   :  { %v689_v5 = vmax.f32 %v496_v47, %v642_v4  ;;  %v644_v43 = vpop.f32.mrb[17].mxu1  ;;  %v4010_v4 = vld [vmem:[%s5604_s5 + $0xe4] ss:$8 sps:$4 sm:$0xff]  }
 0x27e   :  { %v690_v45 = vmax.f32 %v498_v48, %v644_v43  ;;  %v4013_v43 = vld [vmem:[%s5604_s5 + $0xf4] ss:$8 sps:$4 sm:$0xff]  }
 0x280   :  { %v648_v63 = vpop.f32.mrb[18].mxu1  ;;  %801 = vmatprep.mubr.f32.mxu1 %v690_v45  ;;  %939 = vmatprep.mubr.f32.mxu0 %v690_v45  ;;  %v4011_v45 = vld [vmem:[%s5604_s5 + $0xf0] ss:$8 sps:$4 sm:$0xff]  }
 0x281   :  { %v691_v1 = vmax.f32 %v502_v49, %v648_v63  ;;  %v650_v6 = vpop.f32.mrb[19].mxu1  ;;  %802 = vmatmul.mubr.f32.vlgmr.msra.gmra.mrb[32].mxu1 %v689_v5  ;;  %940 = vmatmul.mubr.f32.vlgmr.msra.gmra.mrb[32].mxu0 %v689_v5  ;;  %v4008_v5 = vld [vmem:[%s5604_s5 + $0xe0] ss:$8 sps:$4 sm:$0xff]  }
 0x282   :  { %v692_v7 = vmax.f32 %v504_v50, %v650_v6  ;;  %1658 = vmatpush1.bf16.msra.mxu1 %v3966_v53  ;;  %v3987_v50 = vld [vmem:[%s5604_s5 + $0x70] ss:$8 sps:$4 sm:$0xff]   ;;  %v4016_v53 = vld [vmem:[%s5604_s5 + $0x104] ss:$8 sps:$4 sm:$0xff]  }
 0x283   :  { %1659 = vmatprep.subr.bf16.mxu1 %v3971_v54 }
 0x284   :  { %v654_v10 = vpop.f32.mrb[20].mxu1  ;;  %806 = vmatprep.mubr.f32.mxu1 %v692_v7  ;;  %944 = vmatprep.mubr.f32.mxu0 %v692_v7 }
 0x285   :  { %v693_v11 = vmax.f32 %v508_v51, %v654_v10  ;;  %v656_v12 = vpop.f32.mrb[21].mxu1  ;;  %807 = vmatmul.mubr.f32.gmra.mrb[34].mxu1 %v691_v1  ;;  %945 = vmatmul.mubr.f32.gmra.mrb[34].mxu0 %v691_v1  ;;  %v3992_v51 = vld [vmem:[%s5604_s5 + $0x84] ss:$8 sps:$4 sm:$0xff]  }
 0x286   :  { %v694_v13 = vmax.f32 %v510_v52, %v656_v12  ;;  %1660 = vmatpush1.bf16.msra.mxu1 %v3969_v8  ;;  %v3990_v52 = vld [vmem:[%s5604_s5 + $0x80] ss:$8 sps:$4 sm:$0xff]  }
 0x287   :  { %1661 = vmatprep.subr.bf16.mxu1 %v3974_v9 }
 0x288   :  { %v660_v16 = vpop.f32.mrb[22].mxu1  ;;  %811 = vmatprep.mubr.f32.mxu1 %v694_v13  ;;  %949 = vmatprep.mubr.f32.mxu0 %v694_v13 }
 0x289   :  { %v695_v17 = vmax.f32 %v514_v55, %v660_v16  ;;  %v662_v18 = vpop.f32.mrb[23].mxu1  ;;  %812 = vmatmul.mubr.f32.gmra.mrb[36].mxu1 %v693_v11  ;;  %950 = vmatmul.mubr.f32.gmra.mrb[36].mxu0 %v693_v11  ;;  %v3995_v55 = vld [vmem:[%s5604_s5 + $0x94] ss:$8 sps:$4 sm:$0xff]  }
 0x28a   :  { %v696_v19 = vmax.f32 %v516_v56, %v662_v18  ;;  %1662 = vmatpush1.bf16.msra.mxu1 %v3972_v14  ;;  %v3993_v56 = vld [vmem:[%s5604_s5 + $0x90] ss:$8 sps:$4 sm:$0xff]  }
 0x28b   :  { %1663 = vmatprep.subr.bf16.mxu1 %v3977_v15 }
 0x28c   :  { %v666_v22 = vpop.f32.mrb[24].mxu1  ;;  %816 = vmatprep.mubr.f32.mxu1 %v696_v19  ;;  %954 = vmatprep.mubr.f32.mxu0 %v696_v19 }
 0x28d   :  { %v697_v23 = vmax.f32 %v520_v57, %v666_v22  ;;  %v668_v24 = vpop.f32.mrb[25].mxu1  ;;  %817 = vmatmul.mubr.f32.gmra.mrb[38].mxu1 %v695_v17  ;;  %955 = vmatmul.mubr.f32.gmra.mrb[38].mxu0 %v695_v17  ;;  %v3998_v57 = vld [vmem:[%s5604_s5 + $0xa4] ss:$8 sps:$4 sm:$0xff]  }
 0x28e   :  { %v698_v26 = vmax.f32 %v522_v58, %v668_v24  ;;  %1664 = vmatpush1.bf16.msra.mxu1 %v3975_v20  ;;  %v3996_v58 = vld [vmem:[%s5604_s5 + $0xa0] ss:$8 sps:$4 sm:$0xff]  }
 0x28f   :  { %1665 = vmatprep.subr.bf16.mxu1 %v3980_v21 }
 0x290   :  { %v672_v30 = vpop.f32.mrb[26].mxu1  ;;  %821 = vmatprep.mubr.f32.mxu1 %v698_v26  ;;  %959 = vmatprep.mubr.f32.mxu0 %v698_v26 }
 0x291   :  { %v699_v32 = vmax.f32 %v4863_v59, %v672_v30  ;;  %v674_v33 = vpop.f32.mrb[27].mxu1  ;;  %822 = vmatmul.mubr.f32.gmra.mrb[40].mxu1 %v697_v23  ;;  %960 = vmatmul.mubr.f32.gmra.mrb[40].mxu0 %v697_v23  ;;  %v4001_v59 = vld [vmem:[%s5604_s5 + $0xb4] ss:$8 sps:$4 sm:$0xff]  }
 0x292   :  { %v700_v34 = vmax.f32 %v4865_v60, %v674_v33  ;;  %1666 = vmatpush1.bf16.msra.mxu1 %v3978_v28  ;;  %v3999_v60 = vld [vmem:[%s5604_s5 + $0xb0] ss:$8 sps:$4 sm:$0xff]  }
 0x293   :  { %1667 = vmatprep.subr.bf16.mxu1 %v3983_v29 }
 0x294   :  { %v678_v38 = vpop.f32.mrb[28].mxu1  ;;  %826 = vmatprep.mubr.f32.mxu1 %v700_v34  ;;  %964 = vmatprep.mubr.f32.mxu0 %v700_v34 }
 0x295   :  { %v701_v39 = vmax.f32 %v4867_v61, %v678_v38  ;;  %v680_v40 = vpop.f32.mrb[29].mxu1  ;;  %827 = vmatmul.mubr.f32.gmra.mrb[42].mxu1 %v699_v32  ;;  %965 = vmatmul.mubr.f32.gmra.mrb[42].mxu0 %v699_v32  ;;  %v4004_v61 = vld [vmem:[%s5604_s5 + $0xc4] ss:$8 sps:$4 sm:$0xff]  }
 0x296   :  { %v702_v41 = vmax.f32 %v4869_v62, %v680_v40  ;;  %1668 = vmatpush1.bf16.msra.mxu1 %v3981_v35  ;;  %v4002_v62 = vld [vmem:[%s5604_s5 + $0xc0] ss:$8 sps:$4 sm:$0xff]  }
 0x297   :  { %1669 = vmatprep.subr.bf16.mxu1 %v3986_v36 }
 0x298   :  { %v684_v46 = vpop.f32.mrb[30].mxu1  ;;  %831 = vmatprep.mubr.f32.mxu1 %v702_v41  ;;  %969 = vmatprep.mubr.f32.mxu0 %v702_v41 }
 0x299   :  { %v703_v47 = vmax.f32 %v4871_v2, %v684_v46  ;;  %v686_v48 = vpop.f32.mrb[31].mxu1  ;;  %832 = vmatmul.mubr.f32.gmra.mrb[44].mxu1 %v701_v39  ;;  %970 = vmatmul.mubr.f32.gmra.mrb[44].mxu0 %v701_v39  ;;  %v4007_v2 = vld [vmem:[%s5604_s5 + $0xd4] ss:$8 sps:$4 sm:$0xff]  }
 0x29a   :  { %v704_v49 = vmax.f32 %v4873_v3, %v686_v48  ;;  %1670 = vmatpush1.bf16.msra.mxu1 %v3984_v42  ;;  %v4005_v3 = vld [vmem:[%s5604_s5 + $0xd0] ss:$8 sps:$4 sm:$0xff]  }
 0x29b   :  { %1671 = vmatprep.subr.bf16.mxu1 %v3989_v44 }
 0x29c   :  { %836 = vmatprep.mubr.f32.mxu1 %v704_v49  ;;  %974 = vmatprep.mubr.f32.mxu0 %v704_v49 }
 0x29d   :  { %837 = vmatmul.mubr.f32.gmra.mrb[46].mxu1 %v703_v47  ;;  %975 = vmatmul.mubr.f32.gmra.mrb[46].mxu0 %v703_v47 }
 0x29e   :  { %1672 = vmatpush1.bf16.msra.mxu1 %v3987_v50  ;;  %1929 = vmatprep.mubr.f32.mxu0 %v4273_v25 }
 0x29f   :  { %1673 = vmatprep.subr.bf16.mxu1 %v3992_v51 }
 0x2a2   :  { %1674 = vmatpush1.bf16.msra.mxu1 %v3990_v52 }
 0x2a3   :  { %1675 = vmatprep.subr.bf16.mxu1 %v3995_v55 }
 0x2a6   :  { %1676 = vmatpush1.bf16.msra.mxu1 %v3993_v56 }
 0x2a7   :  { %1677 = vmatprep.subr.bf16.mxu1 %v3998_v57 }
 0x2aa   :  { %1678 = vmatpush1.bf16.msra.mxu1 %v3996_v58 }
 0x2ab   :  { %1679 = vmatprep.subr.bf16.mxu1 %v4001_v59 }
 0x2ae   :  { %1680 = vmatpush1.bf16.msra.mxu1 %v3999_v60 }
 0x2af   :  { %1681 = vmatprep.subr.bf16.mxu1 %v4004_v61 }
 0x2b2   :  { %1682 = vmatpush1.bf16.msra.mxu1 %v4002_v62 }
 0x2b3   :  { %1683 = vmatprep.subr.bf16.mxu1 %v4007_v2 }
 0x2b6   :  { %1684 = vmatpush1.bf16.msra.mxu1 %v4005_v3 }
 0x2b7   :  { %1685 = vmatprep.subr.bf16.mxu1 %v4010_v4 }
 0x2ba   :  { %1686 = vmatpush1.bf16.msra.mxu1 %v4008_v5 }
 0x2bb   :  { %1687 = vmatprep.subr.bf16.mxu1 %v4013_v43 }
 0x2be   :  { %1688 = vmatpush1.bf16.msra.mxu1 %v4011_v45 }
 0x2bf   :  { %1720 = vmatprep.subr.bf16.mxu1 %v4016_v53 }
 0x354   :  { %v3380_v54 = vpop.f32.mrb[32].mxu1  ;;  %v3436_v63 = vpop.f32.mrb[32].mxu0 }
 0x355   :  { %v3381_v1 = vpop.f32.mrb[33].mxu1  ;;  %v3437_v6 = vpop.f32.mrb[33].mxu0 }
 0x356   :  { %v3382_v7 = vadd.f32 %v3381_v1, %v3380_v54  ;;  %v3438_v8 = vadd.f32 %v3437_v6, %v3436_v63 }
 0x358   :  { %v980_v9 = vmax.f32 %v3382_v7, %v3438_v8  ;;  %v3383_v10 = vpop.f32.mrb[34].mxu1  ;;  %v3439_v11 = vpop.f32.mrb[34].mxu0 }
 0x359   :  { %v3384_v12 = vpop.f32.mrb[35].mxu1  ;;  %v3440_v13 = vpop.f32.mrb[35].mxu0 }
 0x35a   :  { %v3385_v14 = vadd.f32 %v3384_v12, %v3383_v10  ;;  %v3441_v15 = vadd.f32 %v3440_v13, %v3439_v11  ;;  %v4978_v16 = vmax.f32 %v980_v9, 0.0 }
 0x35c   :  { %v981_v17 = vmax.f32 %v3385_v14, %v3441_v15  ;;  %v3386_v18 = vpop.f32.mrb[36].mxu1  ;;  %v3442_v19 = vpop.f32.mrb[36].mxu0  ;;  %v999_v26 = vrot.slane %v4978_v16, 1  ;;  %v1005_v35 = vrot.slane %v4978_v16, 2  ;;  %v1017_v36 = vrot.slane %v4978_v16, 4 }
 0x35d   :  { %v3387_v20 = vpop.f32.mrb[37].mxu1  ;;  %v3443_v21 = vpop.f32.mrb[37].mxu0  ;;  %v1011_v40 = vrot.slane %v4978_v16, 3 }
 0x35e   :  { %v4980_v22 = vmax.f32 %v981_v17, 0.0  ;;  %v3388_v23 = vadd.f32 %v3387_v20, %v3386_v18  ;;  %v3444_v24 = vadd.f32 %v3443_v21, %v3442_v19 }
 0x360   :  { %v1006_v28 = vrot.slane %v4980_v22, 2  ;;  %v4985_v29 = vrot.slane %v4980_v22, 4  ;;  %v982_v30 = vmax.f32 %v3388_v23, %v3444_v24  ;;  %v3389_v32 = vpop.f32.mrb[38].mxu1  ;;  %v3445_v33 = vpop.f32.mrb[38].mxu0  ;;  %v1000_v34 = vrot.slane %v4980_v22, 1 }
 0x361   :  { %v3390_v38 = vpop.f32.mrb[39].mxu1  ;;  %v3446_v39 = vpop.f32.mrb[39].mxu0  ;;  %v1012_v41 = vrot.slane %v4980_v22, 3 }
 0x362   :  { %v990_v42 = vmax.f32 %v982_v30, 0.0  ;;  %v3391_v44 = vadd.f32 %v3390_v38, %v3389_v32  ;;  %v3447_v46 = vadd.f32 %v3446_v39, %v3445_v33  ;;  %v4995_v47 = vsel %vm998_vm1, %v999_v26, %v1000_v34 }
 0x363   :  { %v5000_v48 = vsel %vm1010_vm4, %v1011_v40, %v1012_v41  ;;  %v5005_v49 = vsel %vm1004_vm3, %v1005_v35, %v1006_v28  ;;  %v5009_v50 = vsel %vm1016_vm2, %v1017_v36, %v4985_v29 }
 0x364   :  { %v1024_v51 = vrot.slane %v990_v42, 1  ;;  %v1027_v52 = vrot.slane %v990_v42, 2  ;;  %v1030_v55 = vrot.slane %v990_v42, 3  ;;  %v1033_v56 = vrot.slane %v990_v42, 4  ;;  %v3392_v57 = vpop.f32.mrb[40].mxu1  ;;  %v3448_v58 = vpop.f32.mrb[40].mxu0 }
 0x365   :  { %v983_v59 = vmax.f32 %v3391_v44, %v3447_v46  ;;  %v3393_v60 = vpop.f32.mrb[41].mxu1  ;;  %v3449_v61 = vpop.f32.mrb[41].mxu0 }
 0x366   :  { %v3394_v62 = vadd.f32 %v3393_v60, %v3392_v57  ;;  %v3450_v2 = vadd.f32 %v3449_v61, %v3448_v58  ;;  %v1083_v3 = vrot.slane %v1027_v52, 4  ;;  %v1089_v4 = vrot.slane %v1033_v56, 4 }
 0x367   :  { %v5011_v5 = vmax.f32 %v983_v59, 0.0  ;;  %v1079_v43 = vsel %vm1016_vm2, %v4985_v29, %v1033_v56  ;;  %v1080_v63 = vrot.slane %v1024_v51, 4  ;;  %v1086_v6 = vrot.slane %v1030_v55, 4 }
 0x368   :  { %v984_v45 = vmax.f32 %v3394_v62, %v3450_v2  ;;  %v3395_v53 = vpop.f32.mrb[42].mxu1  ;;  %v3451_v54 = vpop.f32.mrb[42].mxu0  ;;  %v1134_v1 = vsel %vm1133_vm5, %v4980_v22, %v1079_v43  ;;  %v4014_v62 = vld [vmem:[%s5604_s5 + $0x100] ss:$8 sps:$4 sm:$0xff]   ;;  %v4022_v22 = vld [vmem:[%s5604_s5 + $0x124] ss:$8 sps:$4 sm:$0xff]  }
 0x369   :  { %v1025_v7 = vrot.slane %v5011_v5, 1  ;;  %v1028_v8 = vrot.slane %v5011_v5, 2  ;;  %v1031_v9 = vrot.slane %v5011_v5, 3  ;;  %v3396_v10 = vpop.f32.mrb[43].mxu1  ;;  %v3452_v11 = vpop.f32.mrb[43].mxu0  ;;  %v1230_v12 = vpack.c.bf16 %v1134_v1, %v4978_v16 }
 0x36a   :  { %v5021_v13 = vmax.f32 %v984_v45, 0.0  ;;  %v3397_v14 = vadd.f32 %v3396_v10, %v3395_v53  ;;  %v3453_v15 = vadd.f32 %v3452_v11, %v3451_v54  ;;  %v1034_v17 = vrot.slane %v5011_v5, 4 }
 0x36b   :  { %v1026_v18 = vsel %vm998_vm1, %v1024_v51, %v1025_v7  ;;  %v1092_v19 = vrot.slane %v1025_v7, 4  ;;  %v5028_v20 = vsel %vm1010_vm4, %v1030_v55, %v1031_v9  ;;  %v5033_v21 = vsel %vm1004_vm3, %v1027_v52, %v1028_v8 }
 0x36c   :  { %v985_v16 = vmax.f32 %v3397_v14, %v3453_v15  ;;  %v3398_v23 = vpop.f32.mrb[44].mxu1  ;;  %v3454_v24 = vpop.f32.mrb[44].mxu0  ;;  %v1081_v26 = vrot.slane %v1026_v18, 4  ;;  %v1038_v30 = vrot.slane %v5021_v13, 1  ;;  %v5039_v32 = vsel %vm1016_vm2, %v1033_v56, %v1034_v17 }
 0x36d   :  { %v3399_v33 = vpop.f32.mrb[45].mxu1  ;;  %v3455_v35 = vpop.f32.mrb[45].mxu0  ;;  %v1090_v36 = vrot.slane %v5039_v32, 4  ;;  %v5045_v38 = vsel %vm1004_vm3, %v5039_v32, %v5011_v5  ;;  %v1087_v39 = vrot.slane %v5028_v20, 4  ;;  %v1084_v40 = vrot.slane %v5033_v21, 4 }
 0x36e   :  { %v5049_v42 = vmax.f32 %v985_v16, 0.0  ;;  %v3400_v44 = vadd.f32 %v3399_v33, %v3398_v23  ;;  %v3456_v46 = vadd.f32 %v3455_v35, %v3454_v24  ;;  %v1082_v51 = vsel %vm1016_vm2, %v1080_v63, %v1081_v26  ;;  %v4031_v5 = vld [vmem:[%s5604_s5 + $0x154] ss:$8 sps:$4 sm:$0xff]   ;;  %v4029_v32 = vld [vmem:[%s5604_s5 + $0x150] ss:$8 sps:$4 sm:$0xff]  }
 0x36f   :  { %v1135_v52 = vsel %vm1133_vm5, %v1000_v34, %v1082_v51  ;;  %v1039_v55 = vsel %vm998_vm1, %v1025_v7, %v1038_v30  ;;  %v1093_v56 = vsel %vm1016_vm2, %v1081_v26, %v1092_v19  ;;  %v1091_v57 = vsel %vm1016_vm2, %v1089_v4, %v1090_v36  ;;  %v4019_v4 = vld [vmem:[%s5604_s5 + $0x114] ss:$8 sps:$4 sm:$0xff]   ;;  %v4020_v51 = vld [vmem:[%s5604_s5 + $0x120] ss:$8 sps:$4 sm:$0xff]  }
 0x370   :  { %v986_v58 = vmax.f32 %v3400_v44, %v3456_v46  ;;  %v3401_v59 = vpop.f32.mrb[46].mxu1  ;;  %v3457_v60 = vpop.f32.mrb[46].mxu0  ;;  %v1231_v61 = vpack.c.bf16 %v1135_v52, %v4995_v47  ;;  %v5065_v2 = vrot.slane %v5049_v42, 1  ;;  %v1140_v34 = vsel %vm1004_vm3, %v1093_v56, %v1039_v55 }
 0x371   :  { %v3402_v43 = vpop.f32.mrb[47].mxu1  ;;  %v3458_v45 = vpop.f32.mrb[47].mxu0  ;;  %v1235_v53 = vpack.c.bf16 %v5021_v13, %v5045_v38  ;;  %v5074_v47 = vrot.slane %v5049_v42, 4  ;;  %v1088_v54 = vsel %vm1016_vm2, %v1086_v6, %v1087_v39  ;;  %v1085_v63 = vsel %vm1016_vm2, %v1083_v3, %v1084_v40 }
 0x372   :  { %v994_v1 = vmax.f32 %v986_v58, 0.0  ;;  %v3403_v7 = vadd.f32 %v3402_v43, %v3401_v59  ;;  %v3459_v10 = vadd.f32 %v3458_v45, %v3457_v60  ;;  %1689 = vmatprep.mubr.bf16.mxu1 %v1231_v61  ;;  %v1041_v11 = vsel %vm998_vm1, %v1038_v30, %v5065_v2 }
 0x373   :  { %1690 = vmatmul.mubr.bf16.vlgmr.msra.gmra.mrb[48].mxu1 %v1230_v12  ;;  %v1236_v14 = vpack.c.bf16 %v1041_v11, %v1140_v34  ;;  %v5085_v15 = vsel %vm1133_vm5, %v1012_v41, %v1088_v54  ;;  %v5090_v6 = vsel %vm1133_vm5, %v1006_v28, %v1085_v63  ;;  %v1051_v3 = vrot.slane %v5021_v13, 3  ;;  %v4017_v12 = vld [vmem:[%s5604_s5 + $0x110] ss:$8 sps:$4 sm:$0xff]  }
 0x374   :  { %v5093_v18 = vrot.slane %v994_v1, 4  ;;  %v987_v19 = vmax.f32 %v3403_v7, %v3459_v10  ;;  %1721 = vmatpush1.bf16.msra.mxu1 %v4014_v62  ;;  %v1065_v20 = vrot.slane %v994_v1, 1  ;;  %v1233_v41 = vpack.c.bf16 %v5085_v15, %v5000_v48  ;;  %v4032_v48 = vld [vmem:[%s5604_s5 + $0x160] ss:$8 sps:$4 sm:$0xff]   ;;  %v4037_v15 = vld [vmem:[%s5604_s5 + $0x174] ss:$8 sps:$4 sm:$0xff]  }
 0x375   :  { %1699 = vmatprep.mubr.bf16.mxu1 %v1236_v14  ;;  %1722 = vmatprep.subr.bf16.mxu1 %v4019_v4  ;;  %v1232_v28 = vpack.c.bf16 %v5090_v6, %v5005_v49  ;;  %v1052_v16 = vrot.slane %v5049_v42, 3  ;;  %v1096_v23 = vrot.slane %v1031_v9, 4  ;;  %v1045_v24 = vrot.slane %v5021_v13, 2  ;;  %v4068_v49 = vld [vmem:[%s5604_s5 + $0x220] ss:$8 sps:$4 sm:$0xff]  }
 0x376   :  { %v5109_v26 = vmax.f32 %v987_v19, 0.0  ;;  %v1066_v30 = vsel %vm998_vm1, %v5065_v2, %v1065_v20  ;;  %v1110_v33 = vsel %vm1016_vm2, %v5074_v47, %v5093_v18  ;;  %v1046_v35 = vrot.slane %v5049_v42, 2  ;;  %v4073_v6 = vld [vmem:[%s5604_s5 + $0x234] ss:$8 sps:$4 sm:$0xff]  }
 0x377   :  { %v1111_v38 = vrot.slane %v1066_v30, 4  ;;  %v1145_v44 = vsel %vm1144_vm6, %v5049_v42, %v1110_v33  ;;  %v5120_v46 = vsel %vm1010_vm4, %v1051_v3, %v1052_v16  ;;  %v1097_v9 = vsel %vm1016_vm2, %v1087_v39, %v1096_v23  ;;  %v4025_v39 = vld [vmem:[%s5604_s5 + $0x134] ss:$8 sps:$4 sm:$0xff]  }
 0x378   :  { %1723 = vmatpush1.bf16.msra.mxu1 %v4017_v12  ;;  %v1067_v52 = vrot.slane %v5109_v26, 1  ;;  %v1240_v55 = vpack.c.bf16 %v5093_v18, %v1145_v44  ;;  %v5129_v56 = vsel %vm1004_vm3, %v1097_v9, %v1051_v3  ;;  %v5132_v58 = vsel %vm1004_vm3, %v1045_v24, %v1046_v35 }
 0x379   :  { %1724 = vmatprep.subr.bf16.mxu1 %v4022_v22  ;;  %v1238_v42 = vpack.c.bf16 %v5120_v46, %v5129_v56  ;;  %v1094_v59 = vrot.slane %v1028_v8, 4  ;;  %v1073_v60 = vrot.slane %v994_v1, 3  ;;  %v1074_v61 = vrot.slane %v5109_v26, 3  ;;  %v4076_v46 = vld [vmem:[%s5604_s5 + $0x244] ss:$8 sps:$4 sm:$0xff]  }
 0x37a   :  { %v1068_v62 = vsel %vm998_vm1, %v1065_v20, %v1067_v52  ;;  %v1069_v34 = vrot.slane %v994_v1, 2  ;;  %v1071_v43 = vrot.slane %v5109_v26, 2  ;;  %v5146_v45 = vsel %vm1133_vm5, %v4985_v29, %v1091_v57  ;;  %v4023_v1 = vld [vmem:[%s5604_s5 + $0x130] ss:$8 sps:$4 sm:$0xff]   ;;  %v4074_v56 = vld [vmem:[%s5604_s5 + $0x240] ss:$8 sps:$4 sm:$0xff]  }
 0x37b   :  { %1700 = vmatmul.mubr.bf16.gmra.mrb[52].mxu1 %v1235_v53  ;;  %v1112_v4 = vrot.slane %v1068_v62, 4  ;;  %v1095_v54 = vsel %vm1016_vm2, %v1084_v40, %v1094_v59  ;;  %v1075_v8 = vsel %vm1010_vm4, %v1073_v60, %v1074_v61  ;;  %v1117_v63 = vrot.slane %v1073_v60, 4  ;;  %v4028_v40 = vld [vmem:[%s5604_s5 + $0x144] ss:$8 sps:$4 sm:$0xff]   ;;  %v4038_v59 = vld [vmem:[%s5604_s5 + $0x180] ss:$8 sps:$4 sm:$0xff]  }
 0x37c   :  { %1725 = vmatpush1.bf16.msra.mxu1 %v4020_v51  ;;  %v5156_v7 = vsel %vm1004_vm3, %v1095_v54, %v1045_v24  ;;  %v1118_v10 = vrot.slane %v1075_v8, 4  ;;  %v1070_v29 = vsel %vm1004_vm3, %v1046_v35, %v1069_v34  ;;  %v1072_v57 = vsel %vm1004_vm3, %v1069_v34, %v1071_v43  ;;  %v4043_v60 = vld [vmem:[%s5604_s5 + $0x194] ss:$8 sps:$4 sm:$0xff]   ;;  %v4041_v61 = vld [vmem:[%s5604_s5 + $0x190] ss:$8 sps:$4 sm:$0xff]  }
 0x37d   :  { %1726 = vmatprep.subr.bf16.mxu1 %v4025_v39  ;;  %v1113_v21 = vsel %vm1016_vm2, %v1111_v38, %v1112_v4  ;;  %v1237_v53 = vpack.c.bf16 %v5132_v58, %v5156_v7  ;;  %v1114_v11 = vrot.slane %v1070_v29, 4  ;;  %v1115_v14 = vrot.slane %v1072_v57, 4  ;;  %v4046_v62 = vld [vmem:[%s5604_s5 + $0x1a4] ss:$8 sps:$4 sm:$0xff]   ;;  %v4044_v34 = vld [vmem:[%s5604_s5 + $0x1a0] ss:$8 sps:$4 sm:$0xff]  }
 0x37e   :  { %v1146_v3 = vsel %vm1144_vm6, %v5065_v2, %v1113_v21  ;;  %v1119_v19 = vsel %vm1016_vm2, %v1117_v63, %v1118_v10  ;;  %v1234_v12 = vpack.c.bf16 %v5146_v45, %v5009_v50  ;;  %v1057_v20 = vrot.slane %v5021_v13, 4  ;;  %v4026_v2 = vld [vmem:[%s5604_s5 + $0x140] ss:$8 sps:$4 sm:$0xff]   ;;  %v4049_v43 = vld [vmem:[%s5604_s5 + $0x1b4] ss:$8 sps:$4 sm:$0xff]  }
 0x37f   :  { %v1241_v22 = vpack.c.bf16 %v1112_v4, %v1146_v3  ;;  %v1148_v23 = vsel %vm1144_vm6, %v1052_v16, %v1119_v19  ;;  %v1116_v24 = vsel %vm1016_vm2, %v1114_v11, %v1115_v14  ;;  %v1098_v30 = vrot.slane %v1034_v17, 4  ;;  %v4047_v4 = vld [vmem:[%s5604_s5 + $0x1b0] ss:$8 sps:$4 sm:$0xff]   ;;  %v4052_v54 = vld [vmem:[%s5604_s5 + $0x1c4] ss:$8 sps:$4 sm:$0xff]  }
 0x380   :  { %1727 = vmatpush1.bf16.msra.mxu1 %v4023_v1  ;;  %v5179_v33 = vpack.c.bf16 %v1118_v10, %v1148_v23  ;;  %v1147_v38 = vsel %vm1144_vm6, %v1046_v35, %v1116_v24  ;;  %v5184_v13 = vsel %vm1016_vm2, %v1057_v20, %v5074_v47  ;;  %v1077_v16 = vrot.slane %v5109_v26, 4  ;;  %v4050_v8 = vld [vmem:[%s5604_s5 + $0x1c0] ss:$8 sps:$4 sm:$0xff]   ;;  %v4055_v63 = vld [vmem:[%s5604_s5 + $0x1d4] ss:$8 sps:$4 sm:$0xff]  }
 0x381   :  { %1709 = vmatprep.mubr.bf16.mxu1 %v1241_v22  ;;  %1728 = vmatprep.subr.bf16.mxu1 %v4028_v40  ;;  %v5190_v17 = vpack.c.bf16 %v1115_v14, %v1147_v38  ;;  %v1099_v44 = vsel %vm1016_vm2, %v1090_v36, %v1098_v30  ;;  %v1120_v51 = vrot.slane %v5093_v18, 4  ;;  %v4034_v36 = vld [vmem:[%s5604_s5 + $0x164] ss:$8 sps:$4 sm:$0xff]   ;;  %v4053_v1 = vld [vmem:[%s5604_s5 + $0x1d0] ss:$8 sps:$4 sm:$0xff]  }
 0x382   :  { %v5196_v35 = vsel %vm1004_vm3, %v1099_v44, %v1057_v20  ;;  %v1078_v9 = vsel %vm1016_vm2, %v5093_v18, %v1077_v16  ;;  %v4058_v10 = vld [vmem:[%s5604_s5 + $0x1e4] ss:$8 sps:$4 sm:$0xff]   ;;  %v4056_v29 = vld [vmem:[%s5604_s5 + $0x1e0] ss:$8 sps:$4 sm:$0xff]   ;;  %v4061_v57 = vld [vmem:[%s5604_s5 + $0x1f4] ss:$8 sps:$4 sm:$0xff]  }
 0x383   :  { %1710 = vmatmul.mubr.bf16.gmra.mrb[56].mxu1 %v1240_v55  ;;  %v1239_v26 = vpack.c.bf16 %v5184_v13, %v5196_v35  ;;  %v1121_v52 = vrot.slane %v1078_v9, 4  ;;  %v4059_v21 = vld [vmem:[%s5604_s5 + $0x1f0] ss:$8 sps:$4 sm:$0xff]   ;;  %v4064_v40 = vld [vmem:[%s5604_s5 + $0x204] ss:$8 sps:$4 sm:$0xff]  }
 0x384   :  { %1729 = vmatpush1.bf16.msra.mxu1 %v4026_v2  ;;  %1752 = vmatprep.mubr.bf16.mxu1 %v1233_v41  ;;  %v4035_v41 = vld [vmem:[%s5604_s5 + $0x170] ss:$8 sps:$4 sm:$0xff]   ;;  %v4062_v11 = vld [vmem:[%s5604_s5 + $0x200] ss:$8 sps:$4 sm:$0xff]   ;;  %v4067_v14 = vld [vmem:[%s5604_s5 + $0x214] ss:$8 sps:$4 sm:$0xff]  }
 0x385   :  { %1730 = vmatprep.subr.bf16.mxu1 %v4031_v5  ;;  %v1122_v55 = vsel %vm1016_vm2, %v1120_v51, %v1121_v52  ;;  %v4065_v3 = vld [vmem:[%s5604_s5 + $0x210] ss:$8 sps:$4 sm:$0xff]   ;;  %v4070_v19 = vld [vmem:[%s5604_s5 + $0x224] ss:$8 sps:$4 sm:$0xff]   ;;  %v4079_v58 = vld [vmem:[%s5604_s5 + $0x254] ss:$8 sps:$4 sm:$0xff]  }
 0x386   :  { %v1149_v18 = vsel %vm1144_vm6, %v5074_v47, %v1122_v55  ;;  %v4040_v47 = vld [vmem:[%s5604_s5 + $0x184] ss:$8 sps:$4 sm:$0xff]   ;;  %v4085_v20 = vld [vmem:[%s5604_s5 + $0x274] ss:$8 sps:$4 sm:$0xff]   ;;  %v4083_v22 = vld [vmem:[%s5604_s5 + $0x270] ss:$8 sps:$4 sm:$0xff]  }
 0x387   :  { %v5215_v39 = vpack.c.bf16 %v1121_v52, %v1149_v18  ;;  %v4082_v7 = vld [vmem:[%s5604_s5 + $0x264] ss:$8 sps:$4 sm:$0xff]   ;;  %v1245_v23 = vld [vmem:[%s5605_s6] sm:$0x3] }
 0x388   :  { %1731 = vmatpush1.bf16.msra.mxu1 %v4029_v32  ;;  %v1250_v24 = vrot.slane %v1245_v23, %v152_v31  ;;  %v1254_v50 = vrot.slane %v1245_v23, %v156_v37  ;;  %v2074_v23 = vld [vmem:[#allocation2 + $0xc0] sm:$0xff] }
 0x389   :  { %1732 = vmatprep.subr.bf16.mxu1 %v4034_v36 }
 0x38c   :  { %1733 = vmatpush1.bf16.msra.mxu1 %v4032_v48 }
 0x38d   :  { %1734 = vmatprep.subr.bf16.mxu1 %v4037_v15 }
 0x390   :  { %1735 = vmatpush1.bf16.msra.mxu1 %v4035_v41 }
 0x391   :  { %1736 = vmatprep.subr.bf16.mxu1 %v4040_v47 }
 0x394   :  { %1737 = vmatpush1.bf16.msra.mxu1 %v4038_v59 }
 0x395   :  { %1738 = vmatprep.subr.bf16.mxu1 %v4043_v60 }
 0x398   :  { %1739 = vmatpush1.bf16.msra.mxu1 %v4041_v61  ;;  %v1846_v61 = vld [vmem:[%s5606_s7] sm:$0xff] }
 0x399   :  { %1740 = vmatprep.subr.bf16.mxu1 %v4046_v62  ;;  %v1847_v62 = vld [vmem:[%s5606_s7 + $0x8] sm:$0xff] }
 0x39c   :  { %1741 = vmatpush1.bf16.msra.mxu1 %v4044_v34  ;;  %v2066_v34 = vld [vmem:[#allocation2 + $0x80] sm:$0xff] }
 0x39d   :  { %1742 = vmatprep.subr.bf16.mxu1 %v4049_v43  ;;  %v2067_v43 = vld [vmem:[#allocation2 + $0x88] sm:$0xff] }
 0x3a0   :  { %1743 = vmatpush1.bf16.msra.mxu1 %v4047_v4  ;;  %v1848_v4 = vld [vmem:[%s5606_s7 + $0x10] sm:$0xf] }
 0x3a1   :  { %1744 = vmatprep.subr.bf16.mxu1 %v4052_v54  ;;  %v3821_v54 = vpack.c.bf16 %v2067_v43, %v2066_v34  ;;  %v2181_v43 = vld [vmem:[#allocation2 + $0x190] sm:$0xff] }
 0x3a4   :  { %1745 = vmatpush1.bf16.msra.mxu1 %v4050_v8  ;;  %v2050_v8 = vld [vmem:[#allocation2] sm:$0xff] }
 0x3a5   :  { %1746 = vmatprep.subr.bf16.mxu1 %v4055_v63  ;;  %v2051_v63 = vld [vmem:[#allocation2 + $0x8] sm:$0xff] }
 0x3a8   :  { %1747 = vmatpush1.bf16.msra.mxu1 %v4053_v1  ;;  %v2068_v1 = vld [vmem:[#allocation2 + $0x90] sm:$0xff] }
 0x3a9   :  { %1748 = vmatprep.subr.bf16.mxu1 %v4058_v10  ;;  %v2069_v10 = vld [vmem:[#allocation2 + $0x98] sm:$0xff] }
 0x3ac   :  { %1749 = vmatpush1.bf16.msra.mxu1 %v4056_v29  ;;  %v3273_v29 = vld [vmem:[%s5606_s7 + $0x18] sm:$0xff] }
 0x3ad   :  { %1750 = vmatprep.subr.bf16.mxu1 %v4061_v57  ;;  %v3823_v57 = vpack.c.bf16 %v2051_v63, %v2050_v8 }
 0x3b0   :  { %1751 = vmatpush1.bf16.msra.mxu1 %v4059_v21  ;;  %v3825_v21 = vpack.c.bf16 %v2069_v10, %v2068_v1 }
 0x3b1   :  { %1783 = vmatprep.subr.bf16.mxu1 %v4064_v40  ;;  %v2052_v40 = vld [vmem:[#allocation2 + $0x10] sm:$0xff] }
 0x3b3   :  { %1753 = vmatmul.mubr.bf16.vlgmr.msra.gmra.mrb[48].mxu1 %v1232_v28  ;;  %v4071_v28 = vld [vmem:[%s5604_s5 + $0x230] ss:$8 sps:$4 sm:$0xff]  }
 0x3b4   :  { %1762 = vmatprep.mubr.bf16.mxu1 %v1238_v42  ;;  %1784 = vmatpush1.bf16.msra.mxu1 %v4062_v11  ;;  %v4077_v42 = vld [vmem:[%s5604_s5 + $0x250] ss:$8 sps:$4 sm:$0xff]  }
 0x3b5   :  { %1785 = vmatprep.subr.bf16.mxu1 %v4067_v14  ;;  %v2053_v11 = vld [vmem:[#allocation2 + $0x18] sm:$0xff]  ;;  %v2070_v14 = vld [vmem:[#allocation2 + $0xa0] sm:$0xff] }
 0x3b8   :  { %1786 = vmatpush1.bf16.msra.mxu1 %v4065_v3  ;;  %v2071_v3 = vld [vmem:[#allocation2 + $0xa8] sm:$0xff] }
 0x3b9   :  { %1787 = vmatprep.subr.bf16.mxu1 %v4070_v19  ;;  %v3274_v19 = vld [vmem:[%s5606_s7 + $0x20] sm:$0xff] }
 0x3bb   :  { %1763 = vmatmul.mubr.bf16.gmra.mrb[52].mxu1 %v1237_v53  ;;  %v4080_v53 = vld [vmem:[%s5604_s5 + $0x260] ss:$8 sps:$4 sm:$0xff]  }
 0x3bc   :  { %1772 = vmatprep.mubr.bf16.mxu1 %v5179_v33  ;;  %1788 = vmatpush1.bf16.msra.mxu1 %v4068_v49  ;;  %v3827_v49 = vpack.c.bf16 %v2053_v11, %v2052_v40  ;;  %v2183_v40 = vld [vmem:[#allocation2 + $0x1a0] sm:$0xff]  ;;  %v2184_v11 = vld [vmem:[#allocation2 + $0x1a8] sm:$0xff] }
 0x3bd   :  { %1789 = vmatprep.subr.bf16.mxu1 %v4073_v6  ;;  %v3829_v6 = vpack.c.bf16 %v2071_v3, %v2070_v14 }
 0x3c0   :  { %1790 = vmatpush1.bf16.msra.mxu1 %v4071_v28  ;;  %v2054_v28 = vld [vmem:[#allocation2 + $0x20] sm:$0xff] }
 0x3c1   :  { %1791 = vmatprep.subr.bf16.mxu1 %v4076_v46  ;;  %v2055_v46 = vld [vmem:[#allocation2 + $0x28] sm:$0xff] }
 0x3c3   :  { %1773 = vmatmul.mubr.bf16.gmra.mrb[56].mxu1 %v5190_v17 }
 0x3c4   :  { %1792 = vmatpush1.bf16.msra.mxu1 %v4074_v56  ;;  %1815 = vmatprep.mubr.bf16.mxu1 %v4272_v0  ;;  %v2072_v56 = vld [vmem:[#allocation2 + $0xb0] sm:$0xff] }
 0x3c5   :  { %1793 = vmatprep.subr.bf16.mxu1 %v4079_v58  ;;  %v2073_v58 = vld [vmem:[#allocation2 + $0xb8] sm:$0xff] }
 0x3c8   :  { %1794 = vmatpush1.bf16.msra.mxu1 %v4077_v42  ;;  %v3275_v42 = vld [vmem:[%s5606_s7 + $0x28] sm:$0xf] }
 0x3c9   :  { %1795 = vmatprep.subr.bf16.mxu1 %v4082_v7  ;;  %v3831_v7 = vpack.c.bf16 %v2055_v46, %v2054_v28  ;;  %v2167_v28 = vld [vmem:[#allocation2 + $0x120] sm:$0xff]  ;;  %v2168_v46 = vld [vmem:[#allocation2 + $0x128] sm:$0xff] }
 0x3cc   :  { %1796 = vmatpush1.bf16.msra.mxu1 %v4080_v53  ;;  %v3833_v53 = vpack.c.bf16 %v2073_v58, %v2072_v56  ;;  %v2185_v58 = vld [vmem:[#allocation2 + $0x1b0] sm:$0xff] }
 0x3cd   :  { %1797 = vmatprep.subr.bf16.mxu1 %v4085_v20  ;;  %v2056_v20 = vld [vmem:[#allocation2 + $0x30] sm:$0xff] }
 0x3d0   :  { %1798 = vmatpush1.bf16.msra.mxu1 %v4083_v22  ;;  %v2057_v22 = vld [vmem:[#allocation2 + $0x38] sm:$0xff] }
 0x3d1   :  { %3613 = vmatprep.subr.bf16.mxu1 %v4273_v25 }
 0x3d3   :  { %1816 = vmatmul.mubr.bf16.vlgmr.msra.gmra.mrb[48].mxu1 %v1234_v12 }
 0x3d4   :  { %1825 = vmatprep.mubr.bf16.mxu1 %v4272_v0 }
 0x3db   :  { %1826 = vmatmul.mubr.bf16.gmra.mrb[52].mxu1 %v1239_v26 }
 0x3dc   :  { %1835 = vmatprep.mubr.bf16.mxu1 %v4272_v0 }
 0x3e3   :  { %1836 = vmatmul.mubr.bf16.gmra.mrb[56].mxu1 %v5215_v39 }
 0x3e4   :  { %3629 = vmatprep.mubr.msk.bf16.mxu1 %vm4275_vm10, %v4273_v25 }
 0x4a6   :  { %v1817_v30 = vpop.f32.mrb[48].mxu1 }
 0x4a7   :  { %v1819_v45 = vpop.f32.mrb[49].mxu1  ;;  %v3885_v2 = vadd.f32 %v1817_v30, %v1250_v24  ;;  %v3835_v30 = vpack.c.bf16 %v2057_v22, %v2056_v20  ;;  %v3863_v22 = vpack.c.bf16 %v2168_v46, %v2167_v28 }
 0x4a8   :  { %v1821_v12 = vpop.f32.mrb[50].mxu1  ;;  %v3886_v13 = vadd.f32 %v1819_v45, %v1254_v50  ;;  %v2058_v45 = vld [vmem:[#allocation2 + $0x40] sm:$0xff] }
 0x4a9   :  { %v3887_v33 = vadd.f32 %v1821_v12, %v1250_v24  ;;  %v1823_v38 = vpop.f32.mrb[51].mxu1  ;;  %v2059_v12 = vld [vmem:[#allocation2 + $0x48] sm:$0xff] }
 0x4aa   :  { %v3888_v0 = vadd.f32 %v1823_v38, %v1254_v50  ;;  %v3839_v38 = vpack.c.bf16 %v2059_v12, %v2058_v45  ;;  %v2188_v45 = vld [vmem:[#allocation2 + $0x1c8] sm:$0xff] }
 0x4ab   :  { %v3795_v16 = vpack.c.bf16 %v3887_v33, %v3885_v2  ;;  %v2076_v2 = vld [vmem:[#allocation2 + $0xd0] sm:$0xff]  ;;  %v2077_v33 = vld [vmem:[#allocation2 + $0xd8] sm:$0xff] }
 0x4ac   :  { %v3793_v5 = vpack.c.bf16 %v3888_v0, %v3886_v13  ;;  %v3841_v13 = vpack.c.bf16 %v2077_v33, %v2076_v2  ;;  %v2060_v0 = vld [vmem:[#allocation2 + $0x50] sm:$0xff]  ;;  %v2171_v33 = vld [vmem:[#allocation2 + $0x140] sm:$0xff] }
 0x4ae   :  { %v1827_v17 = vpop.f32.mrb[52].mxu1  ;;  %3794 = vmatprep.subr.bf16.mxu0 %v3793_v5 }
 0x4af   :  { %v1829_v44 = vpop.f32.mrb[53].mxu1  ;;  %3796 = vmatpush1.bf16.msra.mxu0 %v3795_v16  ;;  %v3889_v9 = vadd.f32 %v1827_v17, %v1250_v24  ;;  %v2078_v17 = vld [vmem:[#allocation2 + $0xe0] sm:$0xff] }
 0x4b0   :  { %v1831_v35 = vpop.f32.mrb[54].mxu1  ;;  %v3890_v51 = vadd.f32 %v1829_v44, %v1254_v50  ;;  %v2079_v44 = vld [vmem:[#allocation2 + $0xe8] sm:$0xff] }
 0x4b1   :  { %v3891_v31 = vadd.f32 %v1831_v35, %v1250_v24  ;;  %v1833_v26 = vpop.f32.mrb[55].mxu1  ;;  %v3845_v35 = vpack.c.bf16 %v2079_v44, %v2078_v17  ;;  %v2173_v17 = vld [vmem:[#allocation2 + $0x150] sm:$0xff]  ;;  %v2174_v44 = vld [vmem:[#allocation2 + $0x158] sm:$0xff] }
 0x4b2   :  { %v3892_v27 = vadd.f32 %v1833_v26, %v1254_v50 }
 0x4b3   :  { %v3799_v37 = vpack.c.bf16 %v3891_v31, %v3889_v9  ;;  %v2062_v9 = vld [vmem:[#allocation2 + $0x60] sm:$0xff]  ;;  %v2063_v31 = vld [vmem:[#allocation2 + $0x68] sm:$0xff] }
 0x4b4   :  { %v3797_v52 = vpack.c.bf16 %v3892_v27, %v3890_v51  ;;  %v3847_v26 = vpack.c.bf16 %v2063_v31, %v2062_v9  ;;  %v2080_v51 = vld [vmem:[#allocation2 + $0xf0] sm:$0xff]  ;;  %v2081_v27 = vld [vmem:[#allocation2 + $0xf8] sm:$0xff]  ;;  %v2192_v9 = vld [vmem:[#allocation2 + $0x1e8] sm:$0xff]  ;;  %v3875_v31 = vpack.c.bf16 %v2174_v44, %v2173_v17 }
 0x4b6   :  { %v1837_v32 = vpop.f32.mrb[56].mxu1  ;;  %3798 = vmatprep.subr.bf16.mxu0 %v3797_v52 }
 0x4b7   :  { %v1839_v36 = vpop.f32.mrb[57].mxu1  ;;  %3800 = vmatpush1.bf16.msra.mxu0 %v3799_v37  ;;  %v3893_v18 = vadd.f32 %v1837_v32, %v1250_v24  ;;  %v2065_v32 = vld [vmem:[#allocation2 + $0x78] sm:$0xff] }
 0x4b8   :  { %v1841_v55 = vpop.f32.mrb[58].mxu1  ;;  %v3894_v15 = vadd.f32 %v1839_v36, %v1254_v50 }
 0x4b9   :  { %v3895_v39 = vadd.f32 %v1841_v55, %v1250_v24  ;;  %v1843_v48 = vpop.f32.mrb[59].mxu1  ;;  %v2075_v24 = vld [vmem:[#allocation2 + $0xc8] sm:$0xff]  ;;  %v2179_v55 = vld [vmem:[#allocation2 + $0x180] sm:$0xff] }
 0x4ba   :  { %v3896_v41 = vadd.f32 %v1843_v48, %v1254_v50  ;;  %v3837_v50 = vpack.c.bf16 %v2075_v24, %v2074_v23  ;;  %v2169_v24 = vld [vmem:[#allocation2 + $0x130] sm:$0xff] }
 0x4bb   :  { %v3804_v47 = vpack.c.bf16 %v3895_v39, %v3893_v18  ;;  %v2180_v18 = vld [vmem:[#allocation2 + $0x188] sm:$0xff] }
 0x4bc   :  { %v3801_v60 = vpack.c.bf16 %v3896_v41, %v3894_v15  ;;  %v3853_v39 = vpack.c.bf16 %v2180_v18, %v2179_v55  ;;  %v2177_v55 = vld [vmem:[#allocation2 + $0x170] sm:$0xff]  ;;  %v2178_v18 = vld [vmem:[#allocation2 + $0x178] sm:$0xff] }
 0x4be   :  { %3803 = vmatprep.subr.msk.bf16.mxu0 %vm5352_vm8, %v3801_v60 }
 0x4bf   :  { %3806 = vmatpush1.bf16.msk.msra.mxu0 %vm5352_vm8, %v3804_v47 }
 0x4c0   :  { %3808 = vmatprep.subr.bf16.mxu0 %v3793_v5 }
 0x4c2   :  { %3270 = vmatmul.mubr.msk.f32.vlgmr.msra.gmra.mrb[48].mxu0 %vm1849_vm9, %v1846_v61  ;;  %v2163_v61 = vld [vmem:[#allocation2 + $0x100] sm:$0xff] }
 0x4c3   :  { %3810 = vmatpush1.bf16.msra.mxu0 %v3795_v16  ;;  %1935 = vmatprep.mubr.f32.mxu0 %v4273_v25  ;;  %v2061_v16 = vld [vmem:[#allocation2 + $0x58] sm:$0xff] }
 0x4c4   :  { %3812 = vmatprep.subr.bf16.mxu0 %v3797_v52  ;;  %v3843_v5 = vpack.c.bf16 %v2061_v16, %v2060_v0  ;;  %v2064_v52 = vld [vmem:[#allocation2 + $0x70] sm:$0xff]  ;;  %v2190_v0 = vld [vmem:[#allocation2 + $0x1d8] sm:$0xff] }
 0x4c5   :  { %v3851_v36 = vpack.c.bf16 %v2065_v32, %v2064_v52  ;;  %v2194_v52 = vld [vmem:[#allocation2 + $0x1f8] sm:$0xff] }
 0x4c6   :  { %3271 = vmatmul.mubr.msk.f32.gmra.mrb[50].mxu0 %vm1849_vm9, %v1847_v62  ;;  %v2164_v62 = vld [vmem:[#allocation2 + $0x108] sm:$0xff] }
 0x4c7   :  { %3814 = vmatpush1.bf16.msra.mxu0 %v3799_v37  ;;  %1941 = vmatprep.mubr.f32.mxu0 %v4273_v25  ;;  %v3849_v37 = vpack.c.bf16 %v2081_v27, %v2080_v51  ;;  %v3855_v1 = vpack.c.bf16 %v2164_v62, %v2163_v61  ;;  %v2175_v51 = vld [vmem:[#allocation2 + $0x160] sm:$0xff]  ;;  %v2176_v27 = vld [vmem:[#allocation2 + $0x168] sm:$0xff]  ;;  %v4092_v61 = vld [vmem:[%s5608_s9 + $0x50] sm:$0xff]  }
 0x4c8   :  { %3817 = vmatprep.subr.msk.bf16.mxu0 %vm5352_vm8, %v3801_v60  ;;  %v3879_v32 = vpack.c.bf16 %v2176_v27, %v2175_v51  ;;  %v4094_v62 = vld [vmem:[%s5608_s9 + $0x110] sm:$0xff]  }
 0x4ca   :  { %3272 = vmatmul.mubr.msk.f32.gmra.mrb[52].mxu0 %vm1849_vm9, %v1848_v4  ;;  %v2182_v4 = vld [vmem:[#allocation2 + $0x198] sm:$0xff] }
 0x4cb   :  { %3820 = vmatpush1.bf16.msk.msra.mxu0 %vm5352_vm8, %v3804_v47  ;;  %2025 = vmatprep.mubr.f32.mxu0 %v4273_v25  ;;  %v3857_v10 = vpack.c.bf16 %v2182_v4, %v2181_v43  ;;  %v4095_v43 = vld [vmem:[%s5608_s9 + $0x58] sm:$0xff]  }
 0x4cc   :  { %3822 = vmatprep.subr.bf16.mxu0 %v3821_v54  ;;  %v4096_v4 = vld [vmem:[%s5608_s9 + $0x18] sm:$0xff]  }
 0x4ce   :  { %3278 = vmatmul.mubr.msk.f32.vlgmr.msra.gmra.mrb[54].mxu0 %vm1849_vm9, %v3273_v29  ;;  %v2165_v29 = vld [vmem:[#allocation2 + $0x110] sm:$0xff] }
 0x4cf   :  { %2031 = vmatprep.mubr.f32.mxu0 %v4273_v25  ;;  %3824 = vmatpush3.bf16.msra.mxu0 %v3823_v57  ;;  %v2166_v57 = vld [vmem:[#allocation2 + $0x118] sm:$0xff] }
 0x4d0   :  { %3826 = vmatprep.subr.bf16.mxu0 %v3825_v21 }
 0x4d2   :  { %3279 = vmatmul.mubr.msk.f32.gmra.mrb[56].mxu0 %vm1849_vm9, %v3274_v19 }
 0x4d3   :  { %2037 = vmatprep.mubr.f32.mxu0 %v4273_v25  ;;  %3828 = vmatpush3.bf16.msra.mxu0 %v3827_v49  ;;  %v3859_v49 = vpack.c.bf16 %v2166_v57, %v2165_v29  ;;  %v4102_v29 = vld [vmem:[%s5608_s9 + $0x28] sm:$0xff]  }
 0x4d4   :  { %3830 = vmatprep.subr.bf16.mxu0 %v3829_v6  ;;  %v3861_v6 = vpack.c.bf16 %v2184_v11, %v2183_v40  ;;  %v4103_v57 = vld [vmem:[%s5608_s9 + $0x128] sm:$0xff]   ;;  %v4106_v40 = vld [vmem:[%s5608_s9 + $0x130] sm:$0xff]  }
 0x4d5   :  { %v4105_v11 = vld [vmem:[%s5608_s9 + $0x30] sm:$0xff]  }
 0x4d6   :  { %3280 = vmatmul.mubr.msk.f32.gmra.mrb[58].mxu0 %vm1849_vm9, %v3275_v42  ;;  %v2186_v42 = vld [vmem:[#allocation2 + $0x1b8] sm:$0xff] }
 0x4d7   :  { %3832 = vmatpush3.bf16.msra.mxu0 %v3831_v7  ;;  %v3865_v23 = vpack.c.bf16 %v2186_v42, %v2185_v58 }
 0x4d8   :  { %3834 = vmatprep.subr.bf16.mxu0 %v3833_v53 }
 0x4db   :  { %3836 = vmatpush3.bf16.msra.mxu0 %v3835_v30  ;;  %v2170_v30 = vld [vmem:[#allocation2 + $0x138] sm:$0xff] }
 0x4dc   :  { %3838 = vmatprep.subr.bf16.mxu0 %v3837_v50  ;;  %v2187_v50 = vld [vmem:[#allocation2 + $0x1c0] sm:$0xff]  ;;  %v3867_v12 = vpack.c.bf16 %v2170_v30, %v2169_v24 }
 0x4dd   :  { %v3869_v2 = vpack.c.bf16 %v2188_v45, %v2187_v50 }
 0x4df   :  { %3840 = vmatpush3.bf16.msra.mxu0 %v3839_v38  ;;  %v2172_v38 = vld [vmem:[#allocation2 + $0x148] sm:$0xff] }
 0x4e0   :  { %3842 = vmatprep.subr.bf16.mxu0 %v3841_v13  ;;  %v2189_v13 = vld [vmem:[#allocation2 + $0x1d0] sm:$0xff]  ;;  %v3871_v16 = vpack.c.bf16 %v2172_v38, %v2171_v33 }
 0x4e3   :  { %3844 = vmatpush3.bf16.msra.mxu0 %v3843_v5  ;;  %v3873_v5 = vpack.c.bf16 %v2190_v0, %v2189_v13 }
 0x4e4   :  { %3846 = vmatprep.subr.bf16.mxu0 %v3845_v35  ;;  %v2191_v35 = vld [vmem:[#allocation2 + $0x1e0] sm:$0xff] }
 0x4e7   :  { %3848 = vmatpush3.bf16.msra.mxu0 %v3847_v26  ;;  %v3877_v26 = vpack.c.bf16 %v2192_v9, %v2191_v35 }
 0x4e8   :  { %3850 = vmatprep.subr.bf16.mxu0 %v3849_v37  ;;  %v2193_v37 = vld [vmem:[#allocation2 + $0x1f0] sm:$0xff] }
 0x4eb   :  { %3852 = vmatpush3.bf16.msra.mxu0 %v3851_v36  ;;  %v3881_v36 = vpack.c.bf16 %v2194_v52, %v2193_v37 }
 0x4ec   :  { %3854 = vmatprep.subr.bf16.mxu0 %v3853_v39  ;;  %v3883_v39 = vpack.c.bf16 %v2178_v18, %v2177_v55 }
 0x595   :  { %v1931_v48 = vpop.f32.mrb[48].mxu0 }
 0x596   :  { %v1933_v15 = vpop.f32.mrb[49].mxu0 }
 0x599   :  { %v1937_v41 = vpop.f32.mrb[50].mxu0 }
 0x59a   :  { %v1939_v47 = vpop.f32.mrb[51].mxu0 }
 0x59d   :  { %v1943_v59 = vpop.f32.mrb[52].mxu0 }
 0x59e   :  { %v1945_v60 = vpop.f32.mrb[53].mxu0 }
 0x5a1   :  { %v2027_v34 = vpop.f32.mrb[54].mxu0 }
 0x5a2   :  { %v5393_v54 = vmax.f32 %v1931_v48, %v2027_v34  ;;  %v2029_v8 = vpop.f32.mrb[55].mxu0  ;;  %v4086_v48 = vld [vmem:[%s5608_s9 + $0x40] sm:$0xff]   ;;  %v4093_v34 = vld [vmem:[%s5608_s9 + $0x10] sm:$0xff]  }
 0x5a3   :  { %v2045_v63 = vmax.f32 %v1933_v15, %v2029_v8  ;;  %v4087_v15 = vld [vmem:[%s5608_s9] sm:$0xff]  }
 0x5a4   :  { %v4098_v8 = vld [vmem:[%s5608_s9 + $0x60] sm:$0xff]  }
 0x5a5   :  { %v2033_v21 = vpop.f32.mrb[56].mxu0  ;;  %2146 = vmatprep.mubr.f32.mxu0 %v2045_v63 }
 0x5a6   :  { %v5395_v14 = vmax.f32 %v1937_v41, %v2033_v21  ;;  %v2035_v3 = vpop.f32.mrb[57].mxu0  ;;  %2147 = vmatmul.mubr.f32.vlgmr.msra.gmra.mrb[60].mxu0 %v5393_v54  ;;  %v4088_v41 = vld [vmem:[%s5608_s9 + $0x100] sm:$0xff]   ;;  %v4104_v21 = vld [vmem:[%s5608_s9 + $0x70] sm:$0xff]  }
 0x5a7   :  { %v2047_v19 = vmax.f32 %v1939_v47, %v2035_v3  ;;  %3856 = vmatpush3.bf16.msra.mxu0 %v3855_v1  ;;  %v4089_v47 = vld [vmem:[%s5608_s9 + $0x48] sm:$0xff]   ;;  %3614 = vmatpush3.bf16.msra.mxu1 %v4088_v41  ;;  %v4099_v1 = vld [vmem:[%s5608_s9 + $0x20] sm:$0xff]   ;;  %v4109_v3 = vld [vmem:[%s5608_s9 + $0x138] sm:$0xff]  }
 0x5a8   :  { %3858 = vmatprep.subr.bf16.mxu0 %v3857_v10  ;;  %3615 = vmatprep.subr.bf16.mxu1 %v4273_v25  ;;  %v4101_v10 = vld [vmem:[%s5608_s9 + $0x68] sm:$0xff]  }
 0x5a9   :  { %v2039_v56 = vpop.f32.mrb[58].mxu0  ;;  %2151 = vmatprep.mubr.f32.mxu0 %v2047_v19 }
 0x5aa   :  { %v2048_v7 = vmax.f32 %v1943_v59, %v2039_v56  ;;  %v2041_v53 = vpop.f32.mrb[59].mxu0  ;;  %2152 = vmatmul.mubr.f32.gmra.mrb[62].mxu0 %v5395_v14  ;;  %v4091_v59 = vld [vmem:[%s5608_s9 + $0x108] sm:$0xff]  }
 0x5ab   :  { %v2049_v20 = vmax.f32 %v1945_v60, %v2041_v53  ;;  %3860 = vmatpush3.bf16.msra.mxu0 %v3859_v49  ;;  %v4090_v60 = vld [vmem:[%s5608_s9 + $0x8] sm:$0xff]   ;;  %3616 = vmatpush3.bf16.msra.mxu1 %v4091_v59  ;;  %v4110_v49 = vld [vmem:[%s5608_s9 + $0xc0] sm:$0xff]  }
 0x5ac   :  { %3862 = vmatprep.subr.bf16.mxu0 %v3861_v6  ;;  %3617 = vmatprep.subr.bf16.mxu1 %v4273_v25 }
 0x5ad   :  { %2156 = vmatprep.mubr.f32.mxu0 %v2049_v20 }
 0x5ae   :  { %2157 = vmatmul.mubr.f32.gmra.mrb[64].mxu0 %v2048_v7 }
 0x5af   :  { %3864 = vmatpush3.bf16.msra.mxu0 %v3863_v22  ;;  %2259 = vmatprep.mubr.f32.mxu0 %v2045_v63  ;;  %v4100_v63 = vld [vmem:[%s5608_s9 + $0x120] sm:$0xff]  }
 0x5b0   :  { %3866 = vmatprep.subr.bf16.mxu0 %v3865_v23  ;;  %3618 = vmatpush3.bf16.msra.mxu1 %v4094_v62 }
 0x5b1   :  { %3619 = vmatprep.subr.bf16.mxu1 %v4273_v25 }
 0x5b3   :  { %3868 = vmatpush3.bf16.msra.mxu0 %v3867_v12 }
 0x5b4   :  { %3870 = vmatprep.subr.bf16.mxu0 %v3869_v2 }
 0x5b7   :  { %3872 = vmatpush3.bf16.msra.mxu0 %v3871_v16 }
 0x5b8   :  { %3874 = vmatprep.subr.bf16.mxu0 %v3873_v5 }
 0x5bb   :  { %3876 = vmatpush3.bf16.msra.mxu0 %v3875_v31 }
 0x5bc   :  { %3878 = vmatprep.subr.bf16.mxu0 %v3877_v26 }
 0x5bf   :  { %3880 = vmatpush3.bf16.msra.mxu0 %v3879_v32 }
 0x5c0   :  { %3882 = vmatprep.subr.bf16.mxu0 %v3881_v36 }
 0x5c3   :  { %3884 = vmatpush3.bf16.msra.mxu0 %v3883_v39 }
 0x5c4   :  { %3542 = vmatprep.subr.bf16.mxu0 %v4086_v48 }
 0x5c6   :  { %2260 = vmatmul.mubr.f32.vlgmr.msra.gmra.mrb[66].mxu0 %v5393_v54  ;;  %v4097_v54 = vld [vmem:[%s5608_s9 + $0x118] sm:$0xff]  }
 0x5c7   :  { %2264 = vmatprep.mubr.f32.mxu0 %v2047_v19  ;;  %3543 = vmatpush3.bf16.msra.mxu0 %v4087_v15  ;;  %v4108_v19 = vld [vmem:[%s5608_s9 + $0x38] sm:$0xff]  }
 0x5c8   :  { %3544 = vmatprep.subr.bf16.mxu0 %v4089_v47  ;;  %3620 = vmatpush3.bf16.msra.mxu1 %v4097_v54 }
 0x5c9   :  { %3621 = vmatprep.subr.bf16.mxu1 %v4273_v25 }
 0x5ca   :  { %2265 = vmatmul.mubr.f32.gmra.mrb[68].mxu0 %v5395_v14  ;;  %v4107_v14 = vld [vmem:[%s5608_s9 + $0x78] sm:$0xff]  }
 0x5cb   :  { %2269 = vmatprep.mubr.f32.mxu0 %v2049_v20  ;;  %3545 = vmatpush3.bf16.msra.mxu0 %v4090_v60 }
 0x5cc   :  { %3546 = vmatprep.subr.bf16.mxu0 %v4092_v61  ;;  %3622 = vmatpush3.bf16.msra.mxu1 %v4100_v63 }
 0x5cd   :  { %3623 = vmatprep.subr.bf16.mxu1 %v4273_v25 }
 0x5ce   :  { %2270 = vmatmul.mubr.f32.gmra.mrb[70].mxu0 %v2048_v7 }
 0x5cf   :  { %3547 = vmatpush3.bf16.msra.mxu0 %v4093_v34 }
 0x5d0   :  { %3548 = vmatprep.subr.bf16.mxu0 %v4095_v43  ;;  %3624 = vmatpush3.bf16.msra.mxu1 %v4103_v57  ;;  %v4111_v57 = vld [vmem:[%s5608_s9 + $0x80] sm:$0xff]  }
 0x5d1   :  { %3625 = vmatprep.subr.bf16.mxu1 %v4273_v25 }
 0x5d3   :  { %3549 = vmatpush3.bf16.msra.mxu0 %v4096_v4 }
 0x5d4   :  { %3550 = vmatprep.subr.bf16.mxu0 %v4098_v8  ;;  %3626 = vmatpush3.bf16.msra.mxu1 %v4106_v40 }
 0x5d5   :  { %3627 = vmatprep.subr.bf16.mxu1 %v4273_v25 }
 0x5d7   :  { %3551 = vmatpush3.bf16.msra.mxu0 %v4099_v1 }
 0x5d8   :  { %3552 = vmatprep.subr.bf16.mxu0 %v4101_v10  ;;  %3628 = vmatpush3.bf16.msra.mxu1 %v4109_v3  ;;  %v4113_v3 = vld [vmem:[%s5608_s9 + $0x88] sm:$0xff]  }
 0x5d9   :  { %3653 = vmatprep.subr.bf16.mxu1 %v4273_v25 }
 0x5db   :  { %3553 = vmatpush3.bf16.msra.mxu0 %v4102_v29 }
 0x5dc   :  { %3554 = vmatprep.subr.bf16.mxu0 %v4104_v21 }
 0x5df   :  { %3555 = vmatpush3.bf16.msra.mxu0 %v4105_v11  ;;  %v4112_v11 = vld [vmem:[%s5608_s9 + $0xc8] sm:$0xff]  }
 0x5e0   :  { %3556 = vmatprep.subr.bf16.mxu0 %v4107_v14 }
 0x5e3   :  { %3557 = vmatpush3.bf16.msra.mxu0 %v4108_v19  ;;  %v4114_v19 = vld [vmem:[%s5608_s9 + $0xd0] sm:$0xff]  }
 0x5e4   :  { %3564 = vmatprep.subr.bf16.mxu0 %v4110_v49  ;;  %v4115_v49 = vld [vmem:[%s5608_s9 + $0x90] sm:$0xff]  }
 0x679   :  { %v3492_v6 = vpop.f32.mrb[60].mxu0 }
 0x67a   :  { %v3493_v28 = vpop.f32.mrb[61].mxu0 }
 0x67b   :  { %v3494_v46 = vadd.f32 %v3493_v28, %v3492_v6  ;;  %v4116_v6 = vld [vmem:[%s5608_s9 + $0xd8] sm:$0xff]  }
 0x67c   :  { %v4117_v28 = vld [vmem:[%s5608_s9 + $0x98] sm:$0xff]  }
 0x67d   :  { %v3495_v56 = vpop.f32.mrb[62].mxu0 }
 0x67e   :  { %v3496_v58 = vpop.f32.mrb[63].mxu0 }
 0x67f   :  { %v3497_v42 = vadd.f32 %v3496_v58, %v3495_v56  ;;  %v4119_v56 = vld [vmem:[%s5608_s9 + $0xa0] sm:$0xff]   ;;  %v4120_v58 = vld [vmem:[%s5608_s9 + $0xe8] sm:$0xff]  }
 0x681   :  { %v3498_v7 = vpop.f32.mrb[64].mxu0 }
 0x682   :  { %v3499_v53 = vpop.f32.mrb[65].mxu0 }
 0x683   :  { %v3500_v20 = vadd.f32 %v3499_v53, %v3498_v7  ;;  %v4122_v7 = vld [vmem:[%s5608_s9 + $0xf0] sm:$0xff]  }
 0x684   :  { %v4123_v53 = vld [vmem:[%s5608_s9 + $0xb0] sm:$0xff]  }
 0x699   :  { %v3533_v22 = vpop.f32.mrb[66].mxu0 }
 0x69a   :  { %v3534_v23 = vpop.f32.mrb[67].mxu0 }
 0x69b   :  { %v3535_v24 = vadd.f32 %v3534_v23, %v3533_v22  ;;  %v4125_v22 = vld [vmem:[%s5608_s9 + $0xb8] sm:$0xff]  }
 0x69d   :  { %v2275_v30 = vmax.f32 %v3494_v46, %v3535_v24  ;;  %v3536_v50 = vpop.f32.mrb[68].mxu0  ;;  %v4118_v46 = vld [vmem:[%s5608_s9 + $0xe0] sm:$0xff]  }
 0x69e   :  { %v3537_v45 = vpop.f32.mrb[69].mxu0  ;;  %v4126_v24 = vld [vmem:[#allocation5] sm:$0xff]  }
 0x69f   :  { %v2278_v12 = vmax.f32 %v2275_v30, 0.0  ;;  %v3538_v2 = vadd.f32 %v3537_v45, %v3536_v50  ;;  %v4127_v30 = vld [vmem:[#allocation5 + $0x8] sm:$0xff]   ;;  %v4128_v50 = vld [vmem:[#allocation5 + $0x10] sm:$0xff]   ;;  %v4129_v45 = vld [vmem:[#allocation5 + $0x18] sm:$0xff]  }
 0x6a1   :  { %v2284_v33 = vrot.slane %v2278_v12, 2  ;;  %v2288_v38 = vrot.slane %v2278_v12, 4  ;;  %v2276_v13 = vmax.f32 %v3497_v42, %v3538_v2  ;;  %v3539_v0 = vpop.f32.mrb[70].mxu0  ;;  %v2282_v16 = vrot.slane %v2278_v12, 1  ;;  %v4121_v42 = vld [vmem:[%s5608_s9 + $0xa8] sm:$0xff]  }
 0x6a2   :  { %v3540_v5 = vpop.f32.mrb[71].mxu0  ;;  %v2286_v41 = vrot.slane %v2278_v12, 3  ;;  %v4131_v2 = vld [vmem:[#allocation5 + $0x28] sm:$0xff]  }
 0x6a3   :  { %v2320_v17 = vsel %vm1144_vm6, %v2278_v12, %v2288_v38  ;;  %v2279_v44 = vmax.f32 %v2276_v13, 0.0  ;;  %v3541_v35 = vadd.f32 %v3540_v5, %v3539_v0  ;;  %v2304_v9 = vrot.slane %v2282_v16, 4  ;;  %v4130_v12 = vld [vmem:[#allocation5 + $0x20] sm:$0xff]  }
 0x6a4   :  { %v2305_v31 = vrot.slane %v2284_v33, 4 }
 0x6a5   :  { %v2292_v26 = vrot.slane %v2279_v44, 4  ;;  %v2277_v51 = vmax.f32 %v3500_v20, %v3541_v35  ;;  %v2293_v27 = vrot.slane %v2279_v44, 1  ;;  %v2321_v37 = vsel %vm1144_vm6, %v2282_v16, %v2304_v9  ;;  %v4124_v20 = vld [vmem:[%s5608_s9 + $0xf8] sm:$0xff]  }
 0x6a6   :  { %v2326_v52 = vsel %vm2325_vm11, %v2320_v17, %v2279_v44  ;;  %v2291_v32 = vrot.slane %v2279_v44, 3  ;;  %v2295_v36 = vrot.slane %v2279_v44, 2  ;;  %v2322_v55 = vsel %vm1144_vm6, %v2284_v33, %v2305_v31  ;;  %v4132_v33 = vld [vmem:[#allocation5 + $0x30] sm:$0xff]  }
 0x6a7   :  { %v2280_v18 = vmax.f32 %v2277_v51, 0.0  ;;  %v2307_v39 = vrot.slane %v2292_v26, 4  ;;  %v2327_v48 = vsel %vm2325_vm11, %v2321_v37, %v2293_v27  ;;  %v2331_v15 = vsel %vm1133_vm5, %v2326_v52, %v2292_v26 }
 0x6a8   :  { %v2306_v47 = vrot.slane %v2291_v32, 4  ;;  %v2328_v59 = vsel %vm2325_vm11, %v2322_v55, %v2295_v36  ;;  %v2416_v40 = vpack.c.bf16 %v2331_v15, %v2331_v15 }
 0x6a9   :  { %v3282_v60 = vrot.slane %v2280_v18, 6  ;;  %v2324_v61 = vsel %vm1144_vm6, %v2288_v38, %v2307_v39  ;;  %v3281_v62 = vrot.slane %v2280_v18, 5  ;;  %v3283_v34 = vrot.slane %v2280_v18, 7  ;;  %v4133_v38 = vld [vmem:[#allocation5 + $0x38] sm:$0xff]  }
 0x6aa   :  { %v2330_v43 = vsel %vm2325_vm11, %v2324_v61, %v2292_v26  ;;  %v2323_v4 = vsel %vm1144_vm6, %v2286_v41, %v2306_v47  ;;  %v3285_v26 = vld [vmem:[%s5609_s10] ss:$0 sm:$0xff] }
 0x6ab   :  { %v2335_v54 = vsel %vm1133_vm5, %v2330_v43, %v2280_v18  ;;  %v2332_v8 = vsel %vm1133_vm5, %v2327_v48, %v3281_v62  ;;  %v2329_v63 = vsel %vm2325_vm11, %v2323_v4, %v2291_v32  ;;  %v2333_v1 = vsel %vm1133_vm5, %v2328_v59, %v3282_v60 }
 0x6ac   :  { %v2420_v10 = vpack.c.bf16 %v2335_v54, %v2335_v54  ;;  %v2417_v29 = vpack.c.bf16 %v2332_v8, %v2332_v8  ;;  %v2334_v21 = vsel %vm1133_vm5, %v2329_v63, %v3283_v34  ;;  %v2418_v23 = vpack.c.bf16 %v2333_v1, %v2333_v1 }
 0x6ad   :  { %v2419_v14 = vpack.c.bf16 %v2334_v21, %v2334_v21 }
 0x6ae   :  { %2700 = vmatprep.mubr.bf16.mxu0 %v2417_v29  ;;  %3630 = vmatmul.mubr.bf16.vlgmr.msra.gmra.mrb[60].mxu1 %v2420_v10 }
 0x6af   :  { %2701 = vmatmul.mubr.bf16.vlgmr.msra.gmra.mrb[72].mxu0 %v2416_v40  ;;  %3669 = vmatprep.mubr.msk.bf16.mxu1 %vm4275_vm10, %v4273_v25  ;;  %v3326_v40 = vld [vmem:[%s5610_s11] ss:$0 sm:$0xff] }
 0x6b0   :  { %3565 = vmatpush3.bf16.msra.mxu0 %v4111_v57  ;;  %2740 = vmatprep.mubr.bf16.mxu0 %v2419_v14  ;;  %v3327_v14 = vld [vmem:[%s5611_s12] ss:$0 sm:$0xff] }
 0x6b1   :  { %3566 = vmatprep.subr.bf16.mxu0 %v4112_v11 }
 0x6b4   :  { %3567 = vmatpush3.bf16.msra.mxu0 %v4113_v3 }
 0x6b5   :  { %3568 = vmatprep.subr.bf16.mxu0 %v4114_v19 }
 0x6b8   :  { %3569 = vmatpush3.bf16.msra.mxu0 %v4115_v49 }
 0x6b9   :  { %3570 = vmatprep.subr.bf16.mxu0 %v4116_v6 }
 0x6bc   :  { %3571 = vmatpush3.bf16.msra.mxu0 %v4117_v28  ;;  %v4134_v28 = vld [vmem:[#allocation7] sm:$0xff]  }
 0x6bd   :  { %3572 = vmatprep.subr.bf16.mxu0 %v4118_v46  ;;  %3654 = vmatpush3.bf16.msra.mxu1 %v4134_v28  ;;  %v4135_v46 = vld [vmem:[#allocation7 + $0x8] sm:$0xff]  }
 0x6be   :  { %3655 = vmatprep.subr.bf16.mxu1 %v4273_v25 }
 0x6c0   :  { %3573 = vmatpush3.bf16.msra.mxu0 %v4119_v56  ;;  %v4136_v56 = vld [vmem:[#allocation7 + $0x10] sm:$0xff]  }
 0x6c1   :  { %3574 = vmatprep.subr.bf16.mxu0 %v4120_v58  ;;  %3656 = vmatpush3.bf16.msra.mxu1 %v4135_v46  ;;  %v4137_v58 = vld [vmem:[#allocation7 + $0x18] sm:$0xff]  }
 0x6c2   :  { %3657 = vmatprep.subr.bf16.mxu1 %v4273_v25 }
 0x6c4   :  { %3575 = vmatpush3.bf16.msra.mxu0 %v4121_v42  ;;  %v4138_v42 = vld [vmem:[#allocation7 + $0x20] sm:$0xff]  }
 0x6c5   :  { %3576 = vmatprep.subr.bf16.mxu0 %v4122_v7  ;;  %3658 = vmatpush3.bf16.msra.mxu1 %v4136_v56  ;;  %v4139_v7 = vld [vmem:[#allocation7 + $0x28] sm:$0xff]  }
 0x6c6   :  { %3659 = vmatprep.subr.bf16.mxu1 %v4273_v25 }
 0x6c8   :  { %3577 = vmatpush3.bf16.msra.mxu0 %v4123_v53  ;;  %v4140_v53 = vld [vmem:[#allocation7 + $0x30] sm:$0xff]  }
 0x6c9   :  { %3578 = vmatprep.subr.bf16.mxu0 %v4124_v20  ;;  %3660 = vmatpush3.bf16.msra.mxu1 %v4137_v58  ;;  %v4141_v20 = vld [vmem:[#allocation7 + $0x38] sm:$0xff]  }
 0x6ca   :  { %3661 = vmatprep.subr.bf16.mxu1 %v4273_v25 }
 0x6cc   :  { %3579 = vmatpush3.bf16.msra.mxu0 %v4125_v22  ;;  %v3328_v22 = vld [vmem:[%s5613_s14] ss:$0 sm:$0xff] }
 0x6cd   :  { %3633 = vmatprep.subr.bf16.mxu0 %v4273_v25  ;;  %3662 = vmatpush3.bf16.msra.mxu1 %v4138_v42 }
 0x6ce   :  { %3663 = vmatprep.subr.bf16.mxu1 %v4273_v25 }
 0x6cf   :  { %2741 = vmatmul.mubr.bf16.vlgmr.msra.gmra.mrb[76].mxu0 %v2418_v23 }
 0x6d0   :  { %3649 = vmatprep.mubr.msk.bf16.mxu0 %vm4275_vm10, %v4273_v25  ;;  %3634 = vmatpush3.bf16.msra.mxu0 %v4126_v24 }
 0x6d1   :  { %3635 = vmatprep.subr.bf16.mxu0 %v4273_v25  ;;  %3664 = vmatpush3.bf16.msra.mxu1 %v4139_v7 }
 0x6d2   :  { %3665 = vmatprep.subr.bf16.mxu1 %v4273_v25 }
 0x6d4   :  { %3636 = vmatpush3.bf16.msra.mxu0 %v4127_v30 }
 0x6d5   :  { %3637 = vmatprep.subr.bf16.mxu0 %v4273_v25  ;;  %3666 = vmatpush3.bf16.msra.mxu1 %v4140_v53 }
 0x6d6   :  { %3667 = vmatprep.subr.bf16.mxu1 %v4273_v25 }
 0x6d8   :  { %3638 = vmatpush3.bf16.msra.mxu0 %v4128_v50 }
 0x6d9   :  { %3639 = vmatprep.subr.bf16.mxu0 %v4273_v25  ;;  %3668 = vmatpush3.bf16.msra.mxu1 %v4141_v20 }
 0x6dc   :  { %3640 = vmatpush3.bf16.msra.mxu0 %v4129_v45 }
 0x6dd   :  { %3641 = vmatprep.subr.bf16.mxu0 %v4273_v25 }
 0x6e0   :  { %3642 = vmatpush3.bf16.msra.mxu0 %v4130_v12 }
 0x6e1   :  { %3643 = vmatprep.subr.bf16.mxu0 %v4273_v25 }
 0x6e4   :  { %3644 = vmatpush3.bf16.msra.mxu0 %v4131_v2 }
 0x6e5   :  { %3645 = vmatprep.subr.bf16.mxu0 %v4273_v25 }
 0x6e8   :  { %3646 = vmatpush3.bf16.msra.mxu0 %v4132_v33 }
 0x6e9   :  { %3647 = vmatprep.subr.bf16.mxu0 %v4273_v25 }
 0x6ec   :  { %3648 = vmatpush3.bf16.msra.mxu0 %v4133_v38 }
 0x781   :  { %v2782_v13 = vpop.f32.mrb[60].mxu1 }
 0x782   :  { %v3558_v0 = vpop.f32.mrb[72].mxu0  ;;  %v3631_v16 = vpop.f32.mrb[61].mxu1 }
 0x783   :  { %v3559_v5 = vpop.f32.mrb[73].mxu0  ;;  %v2785_v17 = vpop.f32.mrb[62].mxu1 }
 0x784   :  { %v3560_v44 = vadd.f32 %v3559_v5, %v3558_v0  ;;  %v3561_v35 = vpop.f32.mrb[74].mxu0  ;;  %v3632_v9 = vpop.f32.mrb[63].mxu1 }
 0x785   :  { %v3562_v31 = vpop.f32.mrb[75].mxu0 }
 0x786   :  { %v2703_v37 = vadd.f32 %v3560_v44, %v3285_v26 }
 0x7a2   :  { %v3580_v51 = vpop.f32.mrb[76].mxu0 }
 0x7a3   :  { %v3581_v27 = vpop.f32.mrb[77].mxu0 }
 0x7a4   :  { %v3582_v52 = vadd.f32 %v3581_v27, %v3580_v51  ;;  %v3583_v32 = vpop.f32.mrb[78].mxu0 }
 0x7a5   :  { %v3584_v36 = vpop.f32.mrb[79].mxu0 }
 0x7a6   :  { %v2743_v55 = vadd.f32 %v3582_v52, %v2703_v37  ;;  %v3337_v36 = vld [vmem:[%s5614_s15] ss:$0 sm:$0xff]  ;;  %s4234_s15 = scalar_lea.vmem %s3098_s2, 64 }
 0x7a7   :  { %p4235_p4 = scmp.ne.s32.totalorder %s3098_s2, %s4234_s15  ;;  %p4240_p6 = scmp.lt.s32.totalorder %s4234_s15, %s4234_s15 }
 0x7a8   :  { %v2783_v18 = vadd.f32 %v2782_v13, %v2743_v55 }
 0x7a9   :  { %p4241_p7 = por %p4240_p6, %p4239_p5 }
 0x7aa   :  { %v2790_v39 = vsel %vm1016_vm2, %v2783_v18, 0.0 }
 0x7ab   :  { %v2791_v48 = vrot.slane %v2790_v39, 4  ;;  %p4242_p8 = pnand %p4241_p7, %p4235_p4 }
 0x7ad   :  { %v2792_v15 = vadd.f32 %v2791_v48, %v2790_v39 }
 0x7af   :  { %v2793_v41 = vrot.slane %v2792_v15, 2 }
 0x7b1   :  { %v2794_v47 = vadd.f32 %v2793_v41, %v2792_v15 }
 0x7b3   :  { %v2795_v59 = vrot.slane %v2794_v47, 1 }
 0x7b5   :  { %v2796_v60 = vadd.f32 %v2795_v59, %v2794_v47  ;;  %v3339_v47 = vld [vmem:[#allocation8] ss:$0 sm:$0xff] }
 0x7b7   :  { %v2798_v61 = vmul.f32 0.25, %v2796_v60 }
 0x7b9   :  { %v2799_v62 = vsub.f32 %v2783_v18, %v2798_v61  ;;  %v3338_v18 = vld [vmem:[%s5615_s16] ss:$0 sm:$0xff] }
 0x7bb   :  { %v2800_v34 = vmul.f32 %v2799_v62, %v2799_v62 }
 0x7bd   :  { %v2801_v43 = vsel %vm1016_vm2, %v2800_v34, 0.0 }
 0x7be   :  { %v2802_v4 = vrot.slane %v2801_v43, 4 }
 0x7c0   :  { %v2803_v54 = vadd.f32 %v2802_v4, %v2801_v43 }
 0x7c2   :  { %v2804_v8 = vrot.slane %v2803_v54, 2 }
 0x7c4   :  { %v2805_v63 = vadd.f32 %v2804_v8, %v2803_v54 }
 0x7c6   :  { %v2806_v1 = vrot.slane %v2805_v63, 1 }
 0x7c8   :  { %v2807_v10 = vadd.f32 %v2806_v1, %v2805_v63 }
 0x7ca   :  { %v2808_v29 = vmul.f32 0.25, %v2807_v10 }
 0x7cc   :  { %v2809_v57 = vadd.f32 1e-05, %v2808_v29 }
 0x7ce   :  { %4142 = vrsqrt.f32 %v2809_v57 }
 0x7d8   :  { %v4143_v21 = vpop.eup %4142 }
 0x7d9   :  { %v2811_v11 = vmul.f32 %v4143_v21, %v2799_v62 }
 0x7db   :  { %v2818_v3 = vmul.f32 %v3326_v40, %v2811_v11 }
 0x7dd   :  { %v2825_v19 = vadd.f32 %v3327_v14, %v2818_v3 }
 0x7df   :  { %v2826_v49 = vmax.f32 %v2825_v19, 0.0 }
 0x7e1   :  { %v2843_v6 = vpack.c.bf16 %v2826_v49, %v2826_v49 }
 0x7e3   :  { %3650 = vmatmul.mubr.bf16.vlgmr.msra.gmra.mrb[80].mxu0 %v2843_v6 }
 0x8b6   :  { %v2933_v23 = vpop.f32.mrb[80].mxu0 }
 0x8b7   :  { %v2934_v24 = vadd.f32 %v3328_v22, %v2933_v23  ;;  %v3651_v30 = vpop.f32.mrb[81].mxu0 }
 0x8b8   :  { %v2936_v50 = vpop.f32.mrb[82].mxu0 }
 0x8b9   :  { %v2941_v45 = vsel %vm1016_vm2, %v2934_v24, 0.0  ;;  %v3652_v12 = vpop.f32.mrb[83].mxu0 }
 0x8ba   :  { %v2942_v2 = vrot.slane %v2941_v45, 4 }
 0x8bc   :  { %v2943_v33 = vadd.f32 %v2942_v2, %v2941_v45 }
 0x8be   :  { %v2944_v38 = vrot.slane %v2943_v33, 2 }
 0x8c0   :  { %v2945_v13 = vadd.f32 %v2944_v38, %v2943_v33 }
 0x8c2   :  { %v2946_v0 = vrot.slane %v2945_v13, 1 }
 0x8c4   :  { %v2947_v16 = vadd.f32 %v2946_v0, %v2945_v13 }
 0x8c6   :  { %v2948_v5 = vmul.f32 0.25, %v2947_v16 }
 0x8c8   :  { %v2949_v25 = vsub.f32 %v2934_v24, %v2948_v5 }
 0x8ca   :  { %v2950_v17 = vmul.f32 %v2949_v25, %v2949_v25 }
 0x8cc   :  { %v2951_v44 = vsel %vm1016_vm2, %v2950_v17, 0.0 }
 0x8cd   :  { %v2952_v35 = vrot.slane %v2951_v44, 4 }
 0x8cf   :  { %v2953_v9 = vadd.f32 %v2952_v35, %v2951_v44 }
 0x8d1   :  { %v2954_v31 = vrot.slane %v2953_v9, 2 }
 0x8d3   :  { %v2955_v26 = vadd.f32 %v2954_v31, %v2953_v9 }
 0x8d5   :  { %v2956_v51 = vrot.slane %v2955_v26, 1 }
 0x8d7   :  { %v2957_v27 = vadd.f32 %v2956_v51, %v2955_v26 }
 0x8d9   :  { %v2958_v37 = vmul.f32 0.25, %v2957_v27 }
 0x8db   :  { %v2959_v52 = vadd.f32 1e-05, %v2958_v37 }
 0x8dd   :  { %4144 = vrsqrt.f32 %v2959_v52 }
 0x8e7   :  { %v4145_v32 = vpop.eup %4144 }
 0x8e8   :  { %v2961_v55 = vmul.f32 %v4145_v32, %v2949_v25 }
 0x8ea   :  { %v2968_v39 = vmul.f32 %v3337_v36, %v2961_v55 }
 0x8ec   :  { %v2975_v48 = vadd.f32 %v3338_v18, %v2968_v39 }
 0x8ee   :  { %v2976_v15 = vmax.f32 %v2975_v48, 0.0 }
 0x8f0   :  { %v2993_v41 = vpack.c.bf16 %v2976_v15, %v2976_v15 }
 0x8f2   :  { %3670 = vmatmul.mubr.bf16.vlgmr.msra.gmra.mrb[64].mxu1 %v2993_v41 }
 0x9c5   :  { %v3083_v59 = vpop.f32.mrb[64].mxu1 }
 0x9c6   :  { %v3084_v60 = vadd.f32 %v3339_v47, %v3083_v59  ;;  %v3671_v61 = vpop.f32.mrb[65].mxu1 }
 0x9c7   :  { %v3086_v62 = vpop.f32.mrb[66].mxu1 }
 0x9c8   :  { %v3672_v34 = vpop.f32.mrb[67].mxu1  ;;  %3090 = vst.msk [vmem:[#allocation10] sm:$0xf] %vm3089_vm12, %v3084_v60 }
 0x9c9   :  { %4245 = shalt.err (!%p4242_p8)
}
 0x9ca   :  { %s4246_s20 = scalar_lea.hbm %s5618_s19, 64 }
 0x9cb   :  { %p4247_p9 = scmp.ne.s32.totalorder %s5618_s19, %s4246_s20  ;;  %p4250_p10 = scmp.lt.u32.totalorder %s4246_s20, %s5618_s19 }
 0x9cd   :  { %p4252_p11 = pnand %p4250_p10, %p4247_p9 }
 0x9cf   :  { %4255 = shalt.err (!%p4252_p11)
}
 0x9d0   :  { %3100 = dma.vmem_to_hbm [thread:$0]  %s3098_s2, 64, %s5618_s19, [#allocation4]  }
 0x9d1   :  { %4262 = dma.done.wait [#allocation4], 64  }
 0x9d2   :  { %4263 = vsyncadd [#allocation4], 4294967232 }
 0x9d3   :  { %3104 = vsyncpa [#allocation3], 1 }
 0x9d4   :  { %3105 = vsyncpa [#allocation6], 1 }
 0x9d5   :  { %3106 = vsyncpa [#allocation9], 1 }
 0x9d6   :  { %3107 = vsyncpa [#allocation4], 1 }

</bundles_post_ra>
